<compile_context>
chip_gen: v6e
topology: v6e:2x2x1
jax: 0.10.0
libtpu: 0.0.40
codegen_flags: <defaults>
</compile_context>

<pallas_src>
import jax
import jax.numpy as jnp
from jax.experimental import pallas as pl
from jax.experimental.pallas import tpu as pltpu


def _round_up(x: int, m: int) -> int:
    return ((x + m - 1) // m) * m


def _vmem_capacity_bytes() -> int:
    try:
        info = pltpu.get_tpu_info()
        v = getattr(info, "vmem_capacity_bytes", None)
        if v:
            return int(v)
    except Exception:
        pass
    return 64 * 1024 * 1024  # conservative (v7x per-TensorCore)


def _default_tiles():
    """Generation-aware (tm, tn, tk) defaults."""
    kind = ""
    try:
        kind = jax.devices()[0].device_kind.lower()
    except Exception:
        pass
    vmem = _vmem_capacity_bytes()
    if "v5" in kind:
        # v5e MXU is 4x128x128: 128-multiples already saturate it; keep DMA modest.
        return 128, 256, 512
    if vmem <= 64 * 1024 * 1024:
        # v7x-class: 2x256x256 MXU but only 64 MiB VMEM / TensorCore -> cap tk.
        return 256, 256, 512
    # v6e-class: 2x256x256 MXU, 128 MiB VMEM.
    return 256, 512, 1024


def _linear_kernel_direct(x_ref, w_ref, b_ref, o_ref):
    """f32-output path: accumulate straight into the resident output block.

    o_ref's index_map ignores the K grid axis, so the block stays in VMEM across
    the whole reduction; the bias is written once at k == 0 (no zeros + final add).
    """
    @pl.when(pl.program_id(2) == 0)
    def _():
        o_ref[...] = jnp.broadcast_to(b_ref[...].astype(o_ref.dtype), o_ref.shape)

    # (tm, tk) @ (tk, tn) -> (tm, tn); contraction dim already on RHS sublanes.
    o_ref[...] += jnp.dot(x_ref[...], w_ref[...], preferred_element_type=jnp.float32)


def _linear_kernel_acc(x_ref, w_ref, b_ref, o_ref, acc_ref):
    """Non-f32-output path: f32 VMEM accumulator, single cast on the last K step."""
    k = pl.program_id(2)

    @pl.when(k == 0)
    def _():
        acc_ref[...] = jnp.broadcast_to(b_ref[...].astype(jnp.float32), acc_ref.shape)

    acc_ref[...] += jnp.dot(x_ref[...], w_ref[...], preferred_element_type=jnp.float32)

    @pl.when(k == pl.num_programs(2) - 1)
    def _():
        o_ref[...] = acc_ref[...].astype(o_ref.dtype)


def linear_pallas(x, weight, bias, *, tm=None, tn=None, tk=None,
                  cast_to_bf16=False, force_pallas=False):
    """Computes x @ weight.T + bias (PyTorch nn.Linear) with a tiled Pallas TPU kernel.

    x:      (B, IN)
    weight: (OUT, IN)   PyTorch nn.Linear layout
    bias:   (OUT,)
    returns (B, OUT), same dtype as x.
    """
    B, IN = x.shape
    OUT, IN2 = weight.shape
    assert IN2 == IN and bias.shape == (OUT,)
    out_dtype = x.dtype

    # Tiny single-tile problems: pallas_call fixed overhead + padding waste
    # (e.g. 8x32x16 pads K 32->128, OUT 16->128) dominate; XLA's fused GEMM wins.
    tiny = (_round_up(B, 8) * _round_up(IN, 128) * _round_up(OUT, 128)
            <= 128 * 512 * 256)
    if tiny and not force_pallas:
        return (x @ weight.T + bias).astype(out_dtype)

    d_tm, d_tn, d_tk = _default_tiles()
    tm = d_tm if tm is None else tm
    tn = d_tn if tn is None else tn
    tk = d_tk if tk is None else tk

    # Clamp tiles to the aligned problem size (sublane x8, lane x128).
    tm = min(tm, _round_up(B, 8))
    tn = min(tn, _round_up(OUT, 128))
    tk = min(tk, _round_up(IN, 128))

    # Keep >= 2 parallel (M x N) blocks when possible so both TensorCores of a
    # v7x megacore get work under dimension_semantics=("parallel","parallel",..).
    if _round_up(B, tm) // tm == 1 and _round_up(OUT, tn) // tn == 1:
        if tn >= 256:
            tn = max(128, _round_up(tn // 2, 128))
        elif tm >= 16:
            tm = max(8, _round_up(tm // 2, 8))

    Mp, Np, Kp = _round_up(B, tm), _round_up(OUT, tn), _round_up(IN, tk)

    compute_dtype = jnp.bfloat16 if cast_to_bf16 else x.dtype

    # Weight transposed once (amortized across calls for a reused layer weight):
    # (IN, OUT) puts the contraction dim on sublanes and OUT lane-dense.
    w_t = weight.T.astype(compute_dtype)
    xp = x.astype(compute_dtype)
    if Mp != B or Kp != IN:
        xp = jnp.pad(xp, ((0, Mp - B), (0, Kp - IN)))
    if Kp != IN or Np != OUT:
        w_t = jnp.pad(w_t, ((0, Kp - IN), (0, Np - OUT)))
    bp = (bias if Np == OUT else jnp.pad(bias, (0, Np - OUT))).reshape(1, Np)

    grid = (Mp // tm, Np // tn, Kp // tk)

    use_acc_scratch = jnp.dtype(out_dtype) != jnp.dtype(jnp.float32)
    kernel = _linear_kernel_acc if use_acc_scratch else _linear_kernel_direct
    scratch = (pltpu.VMEM((tm, tn), jnp.float32),) if use_acc_scratch else ()

    in_itemsize = jnp.dtype(compute_dtype).itemsize
    out_itemsize = jnp.dtype(out_dtype).itemsize

    # Advisory cost (includes Np/tn-fold x re-reads and Mp/tm-fold W re-reads).
    cost = pl.CostEstimate(
        flops=2 * Mp * Kp * Np,
        bytes_accessed=int(in_itemsize * (Mp * Kp * (Np // tn) + Kp * Np * (Mp // tm))
                           + 4 * Np + out_itemsize * Mp * Np),
        transcendentals=0,
    )

    # VMEM budget: double-buffered inputs/bias + output (+ acc scratch) with
    # headroom, capped by what this chip generation actually has.
    footprint = (2 * (tm * tk + tk * tn + tn) * in_itemsize
                 + 2 * tm * tn * out_itemsize
                 + (tm * tn * 4 if use_acc_scratch else 0))
    vmem_limit = int(min(_vmem_capacity_bytes() * 3 // 4,
                         max(32 * 1024 * 1024, 2 * footprint)))

    out = pl.pallas_call(
        kernel,
        out_shape=jax.ShapeDtypeStruct((Mp, Np), out_dtype),
        grid_spec=pltpu.PrefetchScalarGridSpec(
            num_scalar_prefetch=0,
            grid=grid,
            in_specs=[
                pl.BlockSpec((tm, tk), lambda i, j, k: (i, k)),   # x
                pl.BlockSpec((tk, tn), lambda i, j, k: (k, j)),   # W.T  (IN, OUT)
                pl.BlockSpec((1, tn), lambda i, j, k: (0, j)),    # bias
            ],
            out_specs=pl.BlockSpec((tm, tn), lambda i, j, k: (i, j)),
            scratch_shapes=scratch,
        ),
        compiler_params=pltpu.CompilerParams(
            dimension_semantics=("parallel", "parallel", "arbitrary"),
            vmem_limit_bytes=vmem_limit,
        ),
        cost_estimate=cost,
    )(xp, w_t, bp)

    if Mp != B or Np != OUT:
        out = out[:B, :OUT]
    return out


if __name__ == "__main__":
    key = jax.random.PRNGKey(0)
    k1, k2, k3, k4, k5, k6 = jax.random.split(key, 6)

    # --- 1) Small shape implied by the module (8, 32) -> (8, 16): auto path
    #        (tiny-problem fallback), PyTorch-like init. ----------------------
    batch, input_size, output_size = 8, 32, 16
    bound = 1.0 / (input_size ** 0.5)
    w_small = jax.random.uniform(k1, (output_size, input_size),
                                 minval=-bound, maxval=bound, dtype=jnp.float32)
    b_small = jax.random.uniform(k2, (output_size,),
                                 minval=-bound, maxval=bound, dtype=jnp.float32)
    x_small = jax.random.normal(k3, (batch, input_size), dtype=jnp.float32)
    out = jax.block_until_ready(linear_pallas(x_small, w_small, b_small))
    ref = x_small @ w_small.T + b_small
    assert out.shape == (batch, output_size)
    assert jnp.allclose(out, ref, atol=1e-5, rtol=1e-5)

    # --- 2/3/4) Medium shape forced through the Pallas kernel. Small-integer
    #            inputs keep the matmul exact in bf16/f32, so the comparison is
    #            tight regardless of the MXU's f32 pass count. ----------------
    B2, IN2, OUT2 = 256, 1024, 384
    x_med = jax.random.randint(k4, (B2, IN2), -3, 4).astype(jnp.float32)
    w_med = jax.random.randint(k5, (OUT2, IN2), -3, 4).astype(jnp.float32)
    b_med = jax.random.randint(k6, (OUT2,), -5, 6).astype(jnp.float32)
    ref = x_med @ w_med.T + b_med

    # Chip-default tiles.
    out = jax.block_until_ready(linear_pallas(x_med, w_med, b_med,
                                              force_pallas=True))
    assert out.shape == (B2, OUT2)
    assert jnp.allclose(out, ref, atol=1e-3, rtol=1e-3)

    # Small explicit tiles: exercises multi-block M/N grid, N padding and the
    # multi-step K accumulation path.
    out = jax.block_until_ready(
        linear_pallas(x_med, w_med, b_med, tm=64, tn=128, tk=256,
                      force_pallas=True))
    assert jnp.allclose(out, ref, atol=1e-3, rtol=1e-3)

    # bf16 operands, f32 accumulation / f32 output.
    out = jax.block_until_ready(
        linear_pallas(x_med, w_med, b_med, cast_to_bf16=True, force_pallas=True))
    assert jnp.allclose(out, ref, atol=1e-3, rtol=1e-3)

    print("KERNEL_OK")
</pallas_src>

<mosaic_0001>
module attributes {stable_mosaic.version = 11 : i64} {
  func.func @_linear_kernel_direct(%arg0: i32, %arg1: i32, %arg2: i32, %arg3: memref<256x512xf32, #tpu.memory_space<vmem>>, %arg4: memref<512x256xf32, #tpu.memory_space<vmem>>, %arg5: memref<1x256xf32, #tpu.memory_space<vmem>>, %arg6: memref<256x256xf32, #tpu.memory_space<vmem>>) attributes {dimension_semantics = [#tpu.dimension_semantics<parallel>, #tpu.dimension_semantics<parallel>, #tpu.dimension_semantics<arbitrary>], iteration_bounds = array<i64: 1, 2, 2>, scalar_prefetch = 0 : i64, scratch_operands = 0 : i64, tpu.core_type = #tpu.core_type<tc>, window_params = [{transform_indices = @transform_0, window_bounds = array<i64: 256, 512>}, {transform_indices = @transform_1, window_bounds = array<i64: 512, 256>}, {transform_indices = @transform_2, window_bounds = array<i64: 1, 256>}, {transform_indices = @transform_3, window_bounds = array<i64: 256, 256>}]} {
    %c0_i32 = arith.constant 0 : i32
    %0 = arith.cmpi eq, %arg2, %c0_i32 : i32
    %1 = arith.extui %0 : i1 to i32
    %c0_i32_0 = arith.constant 0 : i32
    %2 = arith.cmpi ne, %1, %c0_i32_0 : i32
    scf.if %2 {
      %c0_8 = arith.constant 0 : index
      %c0_9 = arith.constant 0 : index
      %9 = vector.load %arg5[%c0_8, %c0_9] : memref<1x256xf32, #tpu.memory_space<vmem>>, vector<1x256xf32>
      %10 = vector.shape_cast %9 : vector<1x256xf32> to vector<1x256xf32>
      %11 = vector.broadcast %10 : vector<1x256xf32> to vector<256x256xf32>
      %c0_10 = arith.constant 0 : index
      %c0_11 = arith.constant 0 : index
      %12 = vector.load %arg6[%c0_10, %c0_11] : memref<256x256xf32, #tpu.memory_space<vmem>>, vector<256x256xf32>
      tpu.vector_store %arg6[%c0_10, %c0_11], %11 {strides = array<i32>} : memref<256x256xf32, #tpu.memory_space<vmem>>, vector<256x256xf32>,
    } else {
    }
    %c0 = arith.constant 0 : index
    %c0_1 = arith.constant 0 : index
    %3 = vector.load %arg6[%c0, %c0_1] : memref<256x256xf32, #tpu.memory_space<vmem>>, vector<256x256xf32>
    %c0_2 = arith.constant 0 : index
    %c0_3 = arith.constant 0 : index
    %4 = vector.load %arg3[%c0_2, %c0_3] : memref<256x512xf32, #tpu.memory_space<vmem>>, vector<256x512xf32>
    %c0_4 = arith.constant 0 : index
    %c0_5 = arith.constant 0 : index
    %5 = vector.load %arg4[%c0_4, %c0_5] : memref<512x256xf32, #tpu.memory_space<vmem>>, vector<512x256xf32>
    %cst = arith.constant dense<0.000000e+00> : vector<256x256xf32>
    %6 = tpu.matmul %4, %5, %cst {dimension_numbers = #tpu.dot_dimension_numbers<[1], [0], [0], [1], [0, 0, 1, 1], [], []>} : vector<256x512xf32>, vector<512x256xf32>, vector<256x256xf32> -> vector<256x256xf32>
    %7 = arith.addf %3, %6 : vector<256x256xf32>
    %c0_6 = arith.constant 0 : index
    %c0_7 = arith.constant 0 : index
    %8 = vector.load %arg6[%c0_6, %c0_7] : memref<256x256xf32, #tpu.memory_space<vmem>>, vector<256x256xf32>
    tpu.vector_store %arg6[%c0_6, %c0_7], %7 {strides = array<i32>} : memref<256x256xf32, #tpu.memory_space<vmem>>, vector<256x256xf32>,
    return
  }
  func.func @transform_0(%arg0: i32, %arg1: i32, %arg2: i32) -> (i32, i32) {
    %c0_i32 = arith.constant 0 : i32
    return %arg0, %arg2 : i32, i32
  }
  func.func @transform_1(%arg0: i32, %arg1: i32, %arg2: i32) -> (i32, i32) {
    %c0_i32 = arith.constant 0 : i32
    return %arg2, %arg1 : i32, i32
  }
  func.func @transform_2(%arg0: i32, %arg1: i32, %arg2: i32) -> (i32, i32) {
    %c0_i32 = arith.constant 0 : i32
    %c0_i32_0 = arith.constant 0 : i32
    return %c0_i32, %arg1 : i32, i32
  }
  func.func @transform_3(%arg0: i32, %arg1: i32, %arg2: i32) -> (i32, i32) {
    %c0_i32 = arith.constant 0 : i32
    return %arg0, %arg1 : i32, i32
  }
}

</mosaic_0001>

<bundles_post_ra>
// kernel: tpu_custom_call.1
= control target key start
LH: loop header
LB: loop body
LE: loop exit
PB: predicated region body
PF: predicated region fallthrough
CT: control target
= control target key end

     0   :  { %s2793_s0 = inlined_call_operand.hbm [shape: f32[256,1024], index: 0, kind: input, shape index: {}]   ;;  %s2794_s1 = inlined_call_operand.hbm [shape: f32[1024,512], index: 1, kind: input, shape index: {}]   ;;  %s2795_s2 = inlined_call_operand.hbm [shape: f32[1,512], index: 2, kind: input, shape index: {}]   ;;  %s2796_s3 = inlined_call_operand.hbm [shape: f32[256,512], index: 3, kind: output, shape index: {}]  }
   0x1   :  { %2806 = sst [smem:[#allocation20_spill]] %s2793_s0 }
   0x2   :  { %2807 = sst [smem:[#allocation21_spill]] %s2794_s1 }
   0x3   :  { %2808 = sst [smem:[#allocation22_spill]] %s2796_s3 }
   0x4   :  { %8 = vsyncpa [#allocation3], 0 }
   0x5   :  { %10 = vsyncpa [#allocation3 + $0x1], 0 }
   0x6   :  { %11 = vsyncpa [#allocation6], 0 }
   0x7   :  { %13 = vsyncpa [#allocation6 + $0x1], 0 }
   0x8   :  { %14 = vsyncpa [#allocation4], 0 }
   0x9   :  { %16 = vsyncpa [#allocation4 + $0x1], 0  ;;  %s1944_s12 = smov 0   ;;  %s1946_s13 = smov 0  }
   0xa   :  { %s1948_s14 = smov 0   ;;  %s1950_s15 = smov 0  }
   0xb   :  { %s1952_s16 = smov 0   ;;  %s1954_s17 = smov 0  }
   0xc   :  { %s1956_s18 = smov 0   ;;  %s1958_s19 = smov 0  }
   0xd   :  { %s1960_s20 = smov 0   ;;  %s1962_s21 = smov 0  }
   0xe   :  { %s1964_s22 = smov 0   ;;  %s1966_s23 = smov 0  }
   0xf   :  { %s1968_s24 = smov 0   ;;  %s1970_s25 = smov 0  }
  0x10 LB: > { %2809 = sst [smem:[#allocation13_spill]] %s1894_s21  ;;  %s34_s26 = sadd.s32 1, %s1902_s23  ;;  %s1910_s25 = sphi %s1970_s25, %s22_s25   ;;  %s1906_s24 = sphi %s1968_s24, %s2847_s24   ;;  %s1902_s23 = sphi %s1966_s23, %s2846_s23   ;;  %s1898_s22 = sphi %s1964_s22, %s2845_s22   ;;  %s1894_s21 = sphi %s1962_s21, %s2844_s21   ;;  %s1890_s20 = sphi %s1960_s20, %s2856_s20   ;;  %s1886_s19 = sphi %s1958_s19, %s2855_s19   ;;  %s1882_s18 = sphi %s1956_s18, %s2854_s18   ;;  %s1878_s17 = sphi %s1954_s17, %s2853_s17   ;;  %s1874_s16 = sphi %s1952_s16, %s2852_s16   ;;  %s1870_s15 = sphi %s1950_s15, %s2851_s15   ;;  %s1866_s14 = sphi %s1948_s14, %s2850_s14   ;;  %s1862_s13 = sphi %s1946_s13, %s2849_s13   ;;  %s1858_s12 = sphi %s1944_s12, %s2848_s12  }
  0x11   : > { %2810 = sst [smem:[#allocation14_spill]] %s1898_s22  ;;  %p2016_p0 = scmp.ge.s32.totalorder %s34_s26, 2 }
  0x12   : > { %2811 = sst [smem:[#allocation15_spill]] %s1902_s23  ;;  %p58_p1 = scmp.eq.s32.totalorder %s1910_s25, 0 }
  0x13   : > { %2812 = sst [smem:[#allocation16_spill]] %s1906_s24  ;;  %p85_p2 = scmp.ne.s32.totalorder %s1878_s17, %s1874_s16 }
  0x14   : > { %s2858_s26 = smov (%p2016_p0, %s34_s26), 0  ;;  %p2801_p6 = scmp.lt.s32.totalorder %s1910_s25, 4 }
  0x15   : > { %2814 = sst [smem:[#allocation17_spill]] %s2858_s26  ;;  %p2030_p3 = por %p85_p2, %p58_p1 }
  0x16   : > { %s2038_s4 = ssub.s32 %s1902_s23, %s2858_s26  ;;  %s193_s5 = sand.u32 1, %s1910_s25  }
  0x17   : > { %p48_p5 = scmp.eq.s32.totalorder %s2038_s4, 0  ;;  %s195_s6 = sand.u32 1, %s1878_s17  }
  0x18   : > { %s1507_s7 = sshll.u32 %s195_s6, 10  ;;  %s1509_s8 = sshll.u32 %s1906_s24, 1 }
  0x19   : > { %s1527_s9 = sshll.u32 %s1902_s23, 8  ;;  %s197_s11 = scalar_lea.vmem [#allocation5], %s1507_s7 }
  0x1a   : > { %s204_s10 = sadd.s32 %s1527_s9, %s1509_s8  ;;  %s207_s29 = sshll.u32 %s197_s11, 4  ;;  %s208_s29 = int_to_ptr.vmem [resolvable:$true] %s207_s29 }
  0x1b   : > { %s1511_s27 = sshll.u32 %s204_s10, 7  ;;  %s2816_s1 = sld [smem:[#allocation21_spill]] }
  0x1c   : > { %p2053_p7 = pnand %p2801_p6, %p2030_p3  ;;  %p1515_p8 = scmp.ge.s32.totalorder %s1910_s25, 1 }
  0x1d   : > { %s2058_s6 = scalar_lea.sflag [#allocation6], %s193_s5  ;;  %s1687_s7 = scalar_lea.vmem %s208_s29, 16384 }
  0x1e   : > { %p1676_p9 = pneg %p2053_p7  ;;  %p1688_p10 = scmp.ne.s32.totalorder %s208_s29, %s1687_s7 }
  0x1f   : > { %s1912_s8 = smov [#allocation5]  }
  0x20   : > { %p1690_p11 = pnand %p1688_p10, %p1676_p9  ;;  %s1692_s9 = sshll.u32 %s1912_s8, 4  ;;  %s1693_s9 = int_to_ptr.vmem [resolvable:$false] %s1692_s9 }
  0x21   : > { %s206_s21 = scalar_lea.hbm %s2816_s1, %s1511_s27  ;;  %s1694_s3 = scalar_lea.vmem %s1693_s9, 32768 }
  0x22   : > { %p1691_p12 = pneg %p1690_p11  ;;  %p1695_p13 = scmp.lt.s32.totalorder %s208_s29, %s1693_s9 }
  0x23   : > { %p1696_p2 = scmp.lt.s32.totalorder %s1694_s3, %s1687_s7 }
  0x25   : > { %p1697_p3 = por %p1696_p2, %p1695_p13 }
  0x27   : > { %p1698_p4 = pnand %p1697_p3, %p1691_p12 }
  0x29   : > { %1701 = shalt.err (!%p1698_p4)
}
  0x2a   : > { %s2799_s22 = smov 512   ;;  %s1914_s27 = smov 256  }
  0x2b   : > { %s1915_s30 = smov 16   ;;  %p234_p4 = scmp.lt.s32.totalorder %s1910_s25, 5 }
  0x2c   : > { %1544 = dma.hbm_to_vmem [thread:$0]  (!%p2053_p7), %s206_s21, 16384, %s208_s29, %s2058_s6, %s2799_s22, %s1914_s27, %s1915_s30  }
  0x2d   : > { %p2069_p9 = pnand %p1515_p8, %p234_p4  ;;  %s50_s10 = sadd.s32 1, %s1890_s20 }
  0x2e   : > { %p57_p10 = scmp.ne.s32.totalorder %s1890_s20, %s1886_s19  ;;  %p63_p12 = scmp.ne.s32.totalorder %s1886_s19, %s1882_s18 }
  0x2f   : > { %s2079_s11 = scalar_select %p48_p5, %s1890_s20, %s50_s10  }
  0x30   : > { %p59_p11 = por %p58_p1, %p57_p10  ;;  %s169_s7 = sand.u32 1, %s1890_s20  }
  0x31   : > { %2819 = sst [smem:[#allocation18_spill]] %s2079_s11  ;;  %s1526_s8 = sshll.u32 %s1902_s23, 9 }
  0x32   : > { %s1504_s9 = sshll.u32 %s169_s7, 10  ;;  %s2820_s0 = sld [smem:[#allocation20_spill]] }
  0x33   : > { %s173_s29 = scalar_lea.vmem [#allocation2], %s1504_s9  ;;  %p2092_p7 = pnand %p2801_p6, %p59_p11 }
  0x34   : > { %s183_s27 = sshll.u32 %s173_s29, 4  ;;  %s170_s10 = scalar_lea.sflag [#allocation3], %s169_s7  ;;  %s184_s27 = int_to_ptr.vmem [resolvable:$true] %s183_s27 }
  0x35   : > { %p1704_p5 = pneg %p2092_p7  ;;  %s1715_s22 = scalar_lea.vmem %s184_s27, 16384 }
  0x36   : > { %p1716_p8 = scmp.ne.s32.totalorder %s184_s27, %s1715_s22  ;;  %s1916_s1 = smov [#allocation2]  }
  0x37   : > { %s1720_s23 = sshll.u32 %s1916_s1, 4  ;;  %s1721_s23 = int_to_ptr.vmem [resolvable:$false] %s1720_s23 }
  0x38   : > { %s182_s21 = scalar_lea.hbm %s2820_s0, %s1526_s8  ;;  %p1718_p13 = pnand %p1716_p8, %p1704_p5 }
  0x39   : > { %s1722_s8 = scalar_lea.vmem %s1721_s23, 32768  ;;  %p1723_p3 = scmp.lt.s32.totalorder %s184_s27, %s1721_s23 }
  0x3a   : > { %p1719_p2 = pneg %p1718_p13  ;;  %p1724_p4 = scmp.lt.s32.totalorder %s1722_s8, %s1715_s22 }
  0x3c   : > { %p1725_p10 = por %p1724_p4, %p1723_p3 }
  0x3e   : > { %p1726_p11 = pnand %p1725_p10, %p1719_p2 }
  0x40   : > { %1729 = shalt.err (!%p1726_p11)
}
  0x41   : > { %s1917_s9 = smov 1024   ;;  %s1918_s1 = smov 32  }
  0x42   : > { %s2822_s23 = smov 512   ;;  %s2102_s22 = sadd.s32 4294967295, %s1910_s25  }
  0x43   : > { %1541 = dma.hbm_to_vmem [thread:$0]  (!%p2092_p7), %s182_s21, 16384, %s184_s27, %s170_s10, %s1917_s9, %s2822_s23, %s1918_s1  }
  0x44   : > { %s1501_s7 = sadd.s32 4294967294, %s1910_s25   ;;  %s2823_s26 = sadd.s32 1, %s1906_s24 }
  0x45   : > { %s2860_s26 = smov (!%p2016_p0, %s2823_s26), %s1906_s24  ;;  %p64_p5 = scmp.eq.s32.totalorder %s2102_s22, 0 }
  0x46   : > { %s104_s3 = sadd.s32 1, %s1866_s14  ;;  %p39_p7 = scmp.ge.s32.totalorder %s2860_s26, 2 }
  0x47   : > { %p111_p8 = scmp.ne.s32.totalorder %s1866_s14, %s1862_s13  ;;  %p2119_p13 = por %p64_p5, %p63_p12 }
  0x48   : > { %p2825_p2 = scmp.ne.s32.totalorder %s1874_s16, %s1870_s15  ;;  %s2862_s26 = smov (%p39_p7, %s2860_s26), 0 }
  0x49   : > { %2827 = sst [smem:[#allocation19_spill]] %s2862_s26  ;;  %p2139_p3 = por %p111_p8, %p58_p1 }
  0x4a   : > { %p2128_p0 = por %p2825_p2, %p64_p5  ;;  %p117_p12 = scmp.ne.s32.totalorder %s1862_s13, %s1858_s12 }
  0x4b   : > { %s74_s29 = ssub.s32 %s1906_s24, %s2862_s26  ;;  %p143_p4 = scmp.eq.s32.totalorder %s2102_s22, 3 }
  0x4c   : > { %s75_s15 = sor.u32 %s74_s29, %s2038_s4  ;;  %p102_p10 = scmp.eq.s32.totalorder %s74_s29, 0 }
  0x4d   : > { %p76_p11 = scmp.eq.s32.totalorder %s75_s15, 0  ;;  %p2154_p2 = por %p117_p12, %p64_p5 }
  0x4e   : > { %s2159_s30 = scalar_select %p102_p10, %s1866_s14, %s104_s3  }
  0x4f   : > { %s2829_s27 = scalar_select %p2154_p2, 1, 0 }
  0x50   : > { %s2830_s10 = sadd.s32 1, %s1878_s17  ;;  %p2169_p1 = por %p143_p4, %p111_p8 }
  0x51   : > { %s2164_s8 = scalar_select %p76_p11, %s1878_s17, %s2830_s10  }
  0x52   : > { %s2831_s9 = scalar_select %p2169_p1, 1, 0 }
  0x53   : > { %p149_p7 = scmp.eq.s32.totalorder %s1501_s7, 3  ;;  %s219_s4 = sand.u32 1, %s1866_s14  }
  0x54   : > { %s1528_s1 = sshll.u32 %s1906_s24, 5  ;;  %s1512_s29 = sshll.u32 %s219_s4, 1 }
  0x55   : > { %p2178_p6 = por %p149_p7, %p117_p12  ;;  %s227_s0 = scalar_lea.hbm %s2795_s2, %s1528_s1 }
  0x56   : > { %s221_s10 = scalar_lea.vmem [#allocation7], %s1512_s29  ;;  %p2833_p5 = scmp.lt.s32.totalorder %s1910_s25, 4 }
  0x57   : > { %s2832_s23 = scalar_select %p2178_p6, 1, 0 }
  0x58   : > { %s229_s26 = sshll.u32 %s221_s10, 4  ;;  %p2189_p8 = pnand %p2833_p5, %p2139_p3  ;;  %s230_s26 = int_to_ptr.vmem [resolvable:$true] %s229_s26 }
  0x59   : > { %s1743_s7 = scalar_lea.vmem %s230_s26, 32  ;;  %s1919_s4 = smov [#allocation7]  }
  0x5a   : > { %p1732_p12 = pneg %p2189_p8  ;;  %p1744_p4 = scmp.ne.s32.totalorder %s230_s26, %s1743_s7 }
  0x5b   : > { %s1748_s24 = sshll.u32 %s1919_s4, 4  ;;  %s1749_s24 = int_to_ptr.vmem [resolvable:$false] %s1748_s24 }
  0x5c   : > { %p1746_p10 = pnand %p1744_p4, %p1732_p12  ;;  %s1750_s1 = scalar_lea.vmem %s1749_s24, 64 }
  0x5d   : > { %p1751_p7 = scmp.lt.s32.totalorder %s230_s26, %s1749_s24  ;;  %p1752_p6 = scmp.lt.s32.totalorder %s1750_s1, %s1743_s7 }
  0x5e   : > { %p1747_p11 = pneg %p1746_p10 }
  0x5f   : > { %p1753_p1 = por %p1752_p6, %p1751_p7 }
  0x61   : > { %p1754_p2 = pnand %p1753_p1, %p1747_p11 }
  0x63   : > { %1757 = shalt.err (!%p1754_p2)
}
  0x64   : > { %1547 = dma.hbm_to_vmem [thread:$0]  (!%p2189_p8), %s227_s0, 32, %s230_s26, %s2058_s6  }
  0x65   : > { %238 = sbr.rel (%p2069_p9) target bundleno = 573 (0x23d), region = 32  ;;  %s240_s18 = sand.u32 (!%p2069_p9), 1, %s1886_s19  }
  0x66   : > { %s1516_s29 = sshll.u32 (!%p2069_p9), %s240_s18, 10  ;;  %s241_s15 = scalar_lea.sflag (!%p2069_p9), [#allocation3], %s240_s18 }
  0x67   : > { %s2201_s3 = scalar_lea.vmem (!%p2069_p9), [#allocation2], %s1516_s29 }
  0x6a   : > { %1841 = dma.done.wait (%p2119_p13), %s241_s15, 16384  }
  0x6b   : > { %1843 = vsyncadd (%p2119_p13), %s241_s15, 4294950912  ;;  %s249_s24 = sand.u32 1, %s2102_s22   ;;  %s251_s0 = sand.u32 1, %s1874_s16  }
  0x6c   : > { %s1517_s6 = sshll.u32 %s251_s0, 10  ;;  %s250_s5 = scalar_lea.sflag [#allocation6], %s249_s24 }
  0x6d   : > { %s2209_s11 = scalar_lea.vmem [#allocation5], %s1517_s6 }
  0x6e   : > { %1845 = dma.done.wait (%p2128_p0), %s250_s5, 16384  }
  0x6f   : > { %1847 = vsyncadd (%p2128_p0), %s250_s5, 4294950912  ;;  %s2216_s26 = sand.u32 1, %s1862_s13   ;;  %p2835_p6 = scmp.ne.s32.totalorder %s2829_s27, 0 }
  0x70   : > { %s1518_s21 = sshll.u32 %s2216_s26, 1 }
  0x71   : > { %s262_s10 = scalar_lea.vmem [#allocation7], %s1518_s21 }
  0x72   : > { %1849 = dma.done.wait (%p2835_p6), %s250_s5, 32  }
  0x73   : > { %1851 = vsyncadd (%p2835_p6), %s250_s5, 4294967264  ;;  %s1519_s22 = sshll.u32 %s2216_s26, 9  ;;  %s2836_s4 = sld [smem:[#allocation13_spill]] }
  0x74   : > { %s2224_s7 = scalar_lea.vmem [#allocation8], %s1519_s22 }
  0x79   : > { %p1520_p9 = scmp.ne.s32.totalorder %s2836_s4, 0 }
  0x7b   : > { %305 = sbr.rel (%p1520_p9) target bundleno = 168 (0xa8), region = 48 }
  0x80   : > { %v308_v0 = vlaneseq  ;;  %v306_v2 = vld [vmem:[%s262_s10] sm:$0x3] }
  0x82   : > { %v309_v1 = vshrl.u32 %v308_v0, 7 }
  0x84   : > { %v310_v3 = vsub.s32 0, %v309_v1  ;;  %v314_v4 = vsub.s32 1, %v309_v1 }
  0x86   : > { %v311_v5 = vrot.slane %v306_v2, %v310_v3  ;;  %v2227_v6 = vrot.slane %v306_v2, %v314_v4 }
  0x88   : > { %318 = vst [vmem:[%s2224_s7] sm:$0xff] %v311_v5  ;;  %320 = vst [vmem:[%s2224_s7 + $0x10] sm:$0xff] %v311_v5 }
  0x89   : > { %322 = vst [vmem:[%s2224_s7 + $0x20] sm:$0xff] %v311_v5  ;;  %324 = vst [vmem:[%s2224_s7 + $0x30] sm:$0xff] %v311_v5 }
  0x8a   : > { %326 = vst [vmem:[%s2224_s7 + $0x40] sm:$0xff] %v311_v5  ;;  %328 = vst [vmem:[%s2224_s7 + $0x50] sm:$0xff] %v311_v5 }
  0x8b   : > { %330 = vst [vmem:[%s2224_s7 + $0x60] sm:$0xff] %v311_v5  ;;  %332 = vst [vmem:[%s2224_s7 + $0x70] sm:$0xff] %v311_v5 }
  0x8c   : > { %334 = vst [vmem:[%s2224_s7 + $0x80] sm:$0xff] %v311_v5  ;;  %336 = vst [vmem:[%s2224_s7 + $0x90] sm:$0xff] %v311_v5 }
  0x8d   : > { %338 = vst [vmem:[%s2224_s7 + $0xa0] sm:$0xff] %v311_v5  ;;  %340 = vst [vmem:[%s2224_s7 + $0xb0] sm:$0xff] %v311_v5 }
  0x8e   : > { %342 = vst [vmem:[%s2224_s7 + $0xc0] sm:$0xff] %v311_v5  ;;  %344 = vst [vmem:[%s2224_s7 + $0xd0] sm:$0xff] %v311_v5 }
  0x8f   : > { %346 = vst [vmem:[%s2224_s7 + $0xe0] sm:$0xff] %v311_v5  ;;  %348 = vst [vmem:[%s2224_s7 + $0xf0] sm:$0xff] %v311_v5 }
  0x90   : > { %350 = vst [vmem:[%s2224_s7 + $0x100] sm:$0xff] %v311_v5  ;;  %352 = vst [vmem:[%s2224_s7 + $0x110] sm:$0xff] %v311_v5 }
  0x91   : > { %354 = vst [vmem:[%s2224_s7 + $0x120] sm:$0xff] %v311_v5  ;;  %356 = vst [vmem:[%s2224_s7 + $0x130] sm:$0xff] %v311_v5 }
  0x92   : > { %358 = vst [vmem:[%s2224_s7 + $0x140] sm:$0xff] %v311_v5  ;;  %360 = vst [vmem:[%s2224_s7 + $0x150] sm:$0xff] %v311_v5 }
  0x93   : > { %362 = vst [vmem:[%s2224_s7 + $0x160] sm:$0xff] %v311_v5  ;;  %364 = vst [vmem:[%s2224_s7 + $0x170] sm:$0xff] %v311_v5 }
  0x94   : > { %366 = vst [vmem:[%s2224_s7 + $0x180] sm:$0xff] %v311_v5  ;;  %368 = vst [vmem:[%s2224_s7 + $0x190] sm:$0xff] %v311_v5 }
  0x95   : > { %370 = vst [vmem:[%s2224_s7 + $0x1a0] sm:$0xff] %v311_v5  ;;  %372 = vst [vmem:[%s2224_s7 + $0x1b0] sm:$0xff] %v311_v5 }
  0x96   : > { %374 = vst [vmem:[%s2224_s7 + $0x1c0] sm:$0xff] %v311_v5  ;;  %376 = vst [vmem:[%s2224_s7 + $0x1d0] sm:$0xff] %v311_v5 }
  0x97   : > { %378 = vst [vmem:[%s2224_s7 + $0x1e0] sm:$0xff] %v311_v5  ;;  %380 = vst [vmem:[%s2224_s7 + $0x1f0] sm:$0xff] %v311_v5 }
  0x98   : > { %319 = vst [vmem:[%s2224_s7 + $0x8] sm:$0xff] %v2227_v6  ;;  %321 = vst [vmem:[%s2224_s7 + $0x18] sm:$0xff] %v2227_v6 }
  0x99   : > { %323 = vst [vmem:[%s2224_s7 + $0x28] sm:$0xff] %v2227_v6  ;;  %325 = vst [vmem:[%s2224_s7 + $0x38] sm:$0xff] %v2227_v6 }
  0x9a   : > { %327 = vst [vmem:[%s2224_s7 + $0x48] sm:$0xff] %v2227_v6  ;;  %329 = vst [vmem:[%s2224_s7 + $0x58] sm:$0xff] %v2227_v6 }
  0x9b   : > { %331 = vst [vmem:[%s2224_s7 + $0x68] sm:$0xff] %v2227_v6  ;;  %333 = vst [vmem:[%s2224_s7 + $0x78] sm:$0xff] %v2227_v6 }
  0x9c   : > { %335 = vst [vmem:[%s2224_s7 + $0x88] sm:$0xff] %v2227_v6  ;;  %337 = vst [vmem:[%s2224_s7 + $0x98] sm:$0xff] %v2227_v6 }
  0x9d   : > { %339 = vst [vmem:[%s2224_s7 + $0xa8] sm:$0xff] %v2227_v6  ;;  %341 = vst [vmem:[%s2224_s7 + $0xb8] sm:$0xff] %v2227_v6 }
  0x9e   : > { %343 = vst [vmem:[%s2224_s7 + $0xc8] sm:$0xff] %v2227_v6  ;;  %345 = vst [vmem:[%s2224_s7 + $0xd8] sm:$0xff] %v2227_v6 }
  0x9f   : > { %347 = vst [vmem:[%s2224_s7 + $0xe8] sm:$0xff] %v2227_v6  ;;  %349 = vst [vmem:[%s2224_s7 + $0xf8] sm:$0xff] %v2227_v6 }
  0xa0   : > { %351 = vst [vmem:[%s2224_s7 + $0x108] sm:$0xff] %v2227_v6  ;;  %353 = vst [vmem:[%s2224_s7 + $0x118] sm:$0xff] %v2227_v6 }
  0xa1   : > { %355 = vst [vmem:[%s2224_s7 + $0x128] sm:$0xff] %v2227_v6  ;;  %357 = vst [vmem:[%s2224_s7 + $0x138] sm:$0xff] %v2227_v6 }
  0xa2   : > { %359 = vst [vmem:[%s2224_s7 + $0x148] sm:$0xff] %v2227_v6  ;;  %361 = vst [vmem:[%s2224_s7 + $0x158] sm:$0xff] %v2227_v6 }
  0xa3   : > { %363 = vst [vmem:[%s2224_s7 + $0x168] sm:$0xff] %v2227_v6  ;;  %365 = vst [vmem:[%s2224_s7 + $0x178] sm:$0xff] %v2227_v6 }
  0xa4   : > { %367 = vst [vmem:[%s2224_s7 + $0x188] sm:$0xff] %v2227_v6  ;;  %369 = vst [vmem:[%s2224_s7 + $0x198] sm:$0xff] %v2227_v6 }
  0xa5   : > { %371 = vst [vmem:[%s2224_s7 + $0x1a8] sm:$0xff] %v2227_v6  ;;  %373 = vst [vmem:[%s2224_s7 + $0x1b8] sm:$0xff] %v2227_v6 }
  0xa6   : > { %375 = vst [vmem:[%s2224_s7 + $0x1c8] sm:$0xff] %v2227_v6  ;;  %377 = vst [vmem:[%s2224_s7 + $0x1d8] sm:$0xff] %v2227_v6 }
  0xa7   : > { %379 = vst [vmem:[%s2224_s7 + $0x1e8] sm:$0xff] %v2227_v6  ;;  %381 = vst [vmem:[%s2224_s7 + $0x1f8] sm:$0xff] %v2227_v6 }
  0xa8 PF: > { %v605_v7 = vld [vmem:[%s2209_s11 + $0xf8] sm:$0xff]  ;;  %v604_v9 = vld [vmem:[%s2209_s11 + $0xf0] sm:$0xff]  ;;  %v603_v11 = vld [vmem:[%s2209_s11 + $0xe8] sm:$0xff]  ;;  %s2837_s28 = sld [smem:[#allocation14_spill]]  ;;  %s1361_s1 = sshll.u32 %s2224_s7, 4  ;;  %s2714_s1 = int_to_ptr.vmem [resolvable:$true] %s1361_s1 }
  0xa9   : > { %v669_v8 = vld [vmem:[%s2209_s11 + $0x2f8] sm:$0xff]  ;;  %702 = vmatprep.subr.mxu0 %v605_v7  ;;  %v668_v10 = vld [vmem:[%s2209_s11 + $0x2f0] sm:$0xff]  ;;  %v667_v12 = vld [vmem:[%s2209_s11 + $0x2e8] sm:$0xff]  ;;  %s2838_s15 = sld [smem:[#allocation22_spill]]  ;;  %s1345_s0 = scalar_lea.sflag [#allocation4], %s2216_s26 }
  0xaa   : > { %959 = vmatprep.subr.mxu1 %v669_v8  ;;  %703 = vmatpush1.msra.mxu0 %v604_v9  ;;  %v602_v13 = vld [vmem:[%s2209_s11 + $0xe0] sm:$0xff]  ;;  %v601_v15 = vld [vmem:[%s2209_s11 + $0xd8] sm:$0xff]  ;;  %v600_v17 = vld [vmem:[%s2209_s11 + $0xd0] sm:$0xff]  ;;  %s1758_s6 = scalar_lea.vmem %s2714_s1, 8192  ;;  %p2840_p0 = scmp.ne.s32.totalorder %s2831_s9, 0 }
  0xab   : > { %960 = vmatpush1.msra.mxu1 %v668_v10  ;;  %v666_v14 = vld [vmem:[%s2209_s11 + $0x2e0] sm:$0xff]  ;;  %704 = vmatprep.subr.mxu0 %v603_v11  ;;  %v665_v16 = vld [vmem:[%s2209_s11 + $0x2d8] sm:$0xff]  ;;  %v664_v18 = vld [vmem:[%s2209_s11 + $0x2d0] sm:$0xff]  ;;  %p1759_p13 = scmp.ne.s32.totalorder %s2714_s1, %s1758_s6  ;;  %s1920_s5 = smov [#allocation8]  }
  0xac   : > { %961 = vmatprep.subr.mxu1 %v667_v12  ;;  %705 = vmatpush1.msra.mxu0 %v602_v13  ;;  %v599_v19 = vld [vmem:[%s2209_s11 + $0xc8] sm:$0xff]  ;;  %v598_v21 = vld [vmem:[%s2209_s11 + $0xc0] sm:$0xff]  ;;  %v597_v23 = vld [vmem:[%s2209_s11 + $0xb8] sm:$0xff] }
  0xad   : > { %962 = vmatpush1.msra.mxu1 %v666_v14  ;;  %v663_v20 = vld [vmem:[%s2209_s11 + $0x2c8] sm:$0xff]  ;;  %706 = vmatprep.subr.mxu0 %v601_v15  ;;  %v662_v22 = vld [vmem:[%s2209_s11 + $0x2c0] sm:$0xff]  ;;  %v661_v24 = vld [vmem:[%s2209_s11 + $0x2b8] sm:$0xff]  ;;  %p1760_p3 = pnand %p1759_p13, %p2840_p0 }
  0xae   : > { %963 = vmatprep.subr.mxu1 %v665_v16  ;;  %707 = vmatpush1.msra.mxu0 %v600_v17  ;;  %v596_v25 = vld [vmem:[%s2209_s11 + $0xb0] sm:$0xff]  ;;  %v595_v27 = vld [vmem:[%s2209_s11 + $0xa8] sm:$0xff]  ;;  %v594_v29 = vld [vmem:[%s2209_s11 + $0xa0] sm:$0xff]  ;;  %s1529_s27 = sshll.u32 %s2837_s28, 8 }
  0xaf   : > { %964 = vmatpush1.msra.mxu1 %v664_v18  ;;  %708 = vmatprep.subr.mxu0 %v599_v19  ;;  %v660_v26 = vld [vmem:[%s2209_s11 + $0x2b0] sm:$0xff]  ;;  %v659_v28 = vld [vmem:[%s2209_s11 + $0x2a8] sm:$0xff]  ;;  %v658_v30 = vld [vmem:[%s2209_s11 + $0x2a0] sm:$0xff]  ;;  %s2712_s24 = scalar_lea.hbm %s2838_s15, %s1529_s27  ;;  %p1761_p2 = pneg %p1760_p3 }
  0xb0   : > { %965 = vmatprep.subr.mxu1 %v663_v20  ;;  %709 = vmatpush1.msra.mxu0 %v598_v21  ;;  %v593_v31 = vld [vmem:[%s2209_s11 + $0x98] sm:$0xff]  ;;  %v592_v33 = vld [vmem:[%s2209_s11 + $0x90] sm:$0xff]  ;;  %v591_v35 = vld [vmem:[%s2209_s11 + $0x88] sm:$0xff] }
  0xb1   : > { %966 = vmatpush1.msra.mxu1 %v662_v22  ;;  %710 = vmatprep.subr.mxu0 %v597_v23  ;;  %v657_v32 = vld [vmem:[%s2209_s11 + $0x298] sm:$0xff]  ;;  %v656_v34 = vld [vmem:[%s2209_s11 + $0x290] sm:$0xff]  ;;  %v655_v36 = vld [vmem:[%s2209_s11 + $0x288] sm:$0xff] }
  0xb2   : > { %967 = vmatprep.subr.mxu1 %v661_v24  ;;  %711 = vmatpush1.msra.mxu0 %v596_v25  ;;  %v590_v37 = vld [vmem:[%s2209_s11 + $0x80] sm:$0xff]  ;;  %v589_v39 = vld [vmem:[%s2209_s11 + $0x78] sm:$0xff]  ;;  %v588_v41 = vld [vmem:[%s2209_s11 + $0x70] sm:$0xff] }
  0xb3   : > { %968 = vmatpush1.msra.mxu1 %v660_v26  ;;  %712 = vmatprep.subr.mxu0 %v595_v27  ;;  %v654_v38 = vld [vmem:[%s2209_s11 + $0x280] sm:$0xff]  ;;  %v653_v40 = vld [vmem:[%s2209_s11 + $0x278] sm:$0xff]  ;;  %v652_v42 = vld [vmem:[%s2209_s11 + $0x270] sm:$0xff] }
  0xb4   : > { %969 = vmatprep.subr.mxu1 %v659_v28  ;;  %713 = vmatpush1.msra.mxu0 %v594_v29  ;;  %v587_v43 = vld [vmem:[%s2209_s11 + $0x68] sm:$0xff]  ;;  %v586_v45 = vld [vmem:[%s2209_s11 + $0x60] sm:$0xff]  ;;  %v585_v47 = vld [vmem:[%s2209_s11 + $0x58] sm:$0xff] }
  0xb5   : > { %970 = vmatpush1.msra.mxu1 %v658_v30  ;;  %714 = vmatprep.subr.mxu0 %v593_v31  ;;  %v651_v44 = vld [vmem:[%s2209_s11 + $0x268] sm:$0xff]  ;;  %v650_v46 = vld [vmem:[%s2209_s11 + $0x260] sm:$0xff]  ;;  %v649_v48 = vld [vmem:[%s2209_s11 + $0x258] sm:$0xff] }
  0xb6   : > { %971 = vmatprep.subr.mxu1 %v657_v32  ;;  %715 = vmatpush1.msra.mxu0 %v592_v33  ;;  %v584_v49 = vld [vmem:[%s2209_s11 + $0x50] sm:$0xff]  ;;  %v583_v51 = vld [vmem:[%s2209_s11 + $0x48] sm:$0xff]  ;;  %v582_v53 = vld [vmem:[%s2209_s11 + $0x40] sm:$0xff] }
  0xb7   : > { %972 = vmatpush1.msra.mxu1 %v656_v34  ;;  %716 = vmatprep.subr.mxu0 %v591_v35  ;;  %v648_v50 = vld [vmem:[%s2209_s11 + $0x250] sm:$0xff]  ;;  %v647_v52 = vld [vmem:[%s2209_s11 + $0x248] sm:$0xff]  ;;  %v646_v54 = vld [vmem:[%s2209_s11 + $0x240] sm:$0xff] }
  0xb8   : > { %973 = vmatprep.subr.mxu1 %v655_v36  ;;  %717 = vmatpush1.msra.mxu0 %v590_v37  ;;  %v581_v55 = vld [vmem:[%s2209_s11 + $0x38] sm:$0xff]  ;;  %v580_v57 = vld [vmem:[%s2209_s11 + $0x30] sm:$0xff]  ;;  %v579_v59 = vld [vmem:[%s2209_s11 + $0x28] sm:$0xff] }
  0xb9   : > { %974 = vmatpush1.msra.mxu1 %v654_v38  ;;  %718 = vmatprep.subr.mxu0 %v589_v39  ;;  %v645_v56 = vld [vmem:[%s2209_s11 + $0x238] sm:$0xff]  ;;  %v644_v58 = vld [vmem:[%s2209_s11 + $0x230] sm:$0xff]  ;;  %v643_v60 = vld [vmem:[%s2209_s11 + $0x228] sm:$0xff] }
  0xba   : > { %975 = vmatprep.subr.mxu1 %v653_v40  ;;  %719 = vmatpush1.msra.mxu0 %v588_v41  ;;  %v578_v61 = vld [vmem:[%s2209_s11 + $0x20] sm:$0xff]  ;;  %v577_v63 = vld [vmem:[%s2209_s11 + $0x18] sm:$0xff]  ;;  %v576_v1 = vld [vmem:[%s2209_s11 + $0x10] sm:$0xff] }
  0xbb   : > { %976 = vmatpush1.msra.mxu1 %v652_v42  ;;  %720 = vmatprep.subr.mxu0 %v587_v43  ;;  %v642_v62 = vld [vmem:[%s2209_s11 + $0x220] sm:$0xff]  ;;  %v641_v0 = vld [vmem:[%s2209_s11 + $0x218] sm:$0xff]  ;;  %v640_v2 = vld [vmem:[%s2209_s11 + $0x210] sm:$0xff] }
  0xbc   : > { %977 = vmatprep.subr.mxu1 %v651_v44  ;;  %721 = vmatpush1.msra.mxu0 %v586_v45  ;;  %v575_v3 = vld [vmem:[%s2209_s11 + $0x8] sm:$0xff]  ;;  %v574_v5 = vld [vmem:[%s2209_s11] sm:$0xff]  ;;  %v637_v7 = vld [vmem:[%s2209_s11 + $0x1f8] sm:$0xff] }
  0xbd   : > { %978 = vmatpush1.msra.mxu1 %v650_v46  ;;  %722 = vmatprep.subr.mxu0 %v585_v47  ;;  %v639_v4 = vld [vmem:[%s2209_s11 + $0x208] sm:$0xff]  ;;  %v638_v6 = vld [vmem:[%s2209_s11 + $0x200] sm:$0xff]  ;;  %v701_v8 = vld [vmem:[%s2209_s11 + $0x3f8] sm:$0xff] }
  0xbe   : > { %979 = vmatprep.subr.mxu1 %v649_v48  ;;  %723 = vmatpush1.msra.mxu0 %v584_v49  ;;  %v636_v9 = vld [vmem:[%s2209_s11 + $0x1f0] sm:$0xff]  ;;  %v635_v11 = vld [vmem:[%s2209_s11 + $0x1e8] sm:$0xff]  ;;  %v634_v13 = vld [vmem:[%s2209_s11 + $0x1e0] sm:$0xff] }
  0xbf   : > { %980 = vmatpush1.msra.mxu1 %v648_v50  ;;  %724 = vmatprep.subr.mxu0 %v583_v51  ;;  %v700_v10 = vld [vmem:[%s2209_s11 + $0x3f0] sm:$0xff]  ;;  %v699_v12 = vld [vmem:[%s2209_s11 + $0x3e8] sm:$0xff]  ;;  %v698_v14 = vld [vmem:[%s2209_s11 + $0x3e0] sm:$0xff] }
  0xc0   : > { %981 = vmatprep.subr.mxu1 %v647_v52  ;;  %725 = vmatpush1.msra.mxu0 %v582_v53  ;;  %v633_v15 = vld [vmem:[%s2209_s11 + $0x1d8] sm:$0xff]  ;;  %v632_v17 = vld [vmem:[%s2209_s11 + $0x1d0] sm:$0xff]  ;;  %v631_v19 = vld [vmem:[%s2209_s11 + $0x1c8] sm:$0xff] }
  0xc1   : > { %982 = vmatpush1.msra.mxu1 %v646_v54  ;;  %726 = vmatprep.subr.mxu0 %v581_v55  ;;  %v697_v16 = vld [vmem:[%s2209_s11 + $0x3d8] sm:$0xff]  ;;  %v696_v18 = vld [vmem:[%s2209_s11 + $0x3d0] sm:$0xff]  ;;  %v695_v20 = vld [vmem:[%s2209_s11 + $0x3c8] sm:$0xff] }
  0xc2   : > { %983 = vmatprep.subr.mxu1 %v645_v56  ;;  %727 = vmatpush1.msra.mxu0 %v580_v57  ;;  %v630_v21 = vld [vmem:[%s2209_s11 + $0x1c0] sm:$0xff]  ;;  %v629_v23 = vld [vmem:[%s2209_s11 + $0x1b8] sm:$0xff]  ;;  %v628_v25 = vld [vmem:[%s2209_s11 + $0x1b0] sm:$0xff] }
  0xc3   : > { %984 = vmatpush1.msra.mxu1 %v644_v58  ;;  %728 = vmatprep.subr.mxu0 %v579_v59  ;;  %v694_v22 = vld [vmem:[%s2209_s11 + $0x3c0] sm:$0xff]  ;;  %v693_v24 = vld [vmem:[%s2209_s11 + $0x3b8] sm:$0xff]  ;;  %v692_v26 = vld [vmem:[%s2209_s11 + $0x3b0] sm:$0xff] }
  0xc4   : > { %985 = vmatprep.subr.mxu1 %v643_v60  ;;  %729 = vmatpush1.msra.mxu0 %v578_v61  ;;  %v627_v27 = vld [vmem:[%s2209_s11 + $0x1a8] sm:$0xff]  ;;  %v626_v29 = vld [vmem:[%s2209_s11 + $0x1a0] sm:$0xff]  ;;  %v625_v31 = vld [vmem:[%s2209_s11 + $0x198] sm:$0xff] }
  0xc5   : > { %986 = vmatpush1.msra.mxu1 %v642_v62  ;;  %730 = vmatprep.subr.mxu0 %v577_v63  ;;  %v691_v28 = vld [vmem:[%s2209_s11 + $0x3a8] sm:$0xff]  ;;  %v690_v30 = vld [vmem:[%s2209_s11 + $0x3a0] sm:$0xff]  ;;  %v689_v32 = vld [vmem:[%s2209_s11 + $0x398] sm:$0xff] }
  0xc6   : > { %987 = vmatprep.subr.mxu1 %v641_v0  ;;  %731 = vmatpush1.msra.mxu0 %v576_v1  ;;  %v624_v33 = vld [vmem:[%s2209_s11 + $0x190] sm:$0xff]  ;;  %v623_v35 = vld [vmem:[%s2209_s11 + $0x188] sm:$0xff]  ;;  %v622_v37 = vld [vmem:[%s2209_s11 + $0x180] sm:$0xff] }
  0xc7   : > { %988 = vmatpush1.msra.mxu1 %v640_v2  ;;  %732 = vmatprep.subr.mxu0 %v575_v3  ;;  %v688_v34 = vld [vmem:[%s2209_s11 + $0x390] sm:$0xff]  ;;  %v687_v36 = vld [vmem:[%s2209_s11 + $0x388] sm:$0xff]  ;;  %v686_v38 = vld [vmem:[%s2209_s11 + $0x380] sm:$0xff] }
  0xc8   : > { %989 = vmatprep.subr.mxu1 %v639_v4  ;;  %733 = vmatpush1.msra.mxu0 %v574_v5  ;;  %v621_v39 = vld [vmem:[%s2209_s11 + $0x178] sm:$0xff]  ;;  %v620_v41 = vld [vmem:[%s2209_s11 + $0x170] sm:$0xff]  ;;  %v619_v43 = vld [vmem:[%s2209_s11 + $0x168] sm:$0xff] }
  0xc9   : > { %990 = vmatpush1.msra.mxu1 %v638_v6  ;;  %734 = vmatprep.subr.mxu0 %v637_v7  ;;  %v685_v40 = vld [vmem:[%s2209_s11 + $0x378] sm:$0xff]  ;;  %v684_v42 = vld [vmem:[%s2209_s11 + $0x370] sm:$0xff]  ;;  %v683_v44 = vld [vmem:[%s2209_s11 + $0x368] sm:$0xff] }
  0xca   : > { %991 = vmatprep.subr.mxu1 %v701_v8  ;;  %735 = vmatpush2.msra.mxu0 %v636_v9  ;;  %v618_v45 = vld [vmem:[%s2209_s11 + $0x160] sm:$0xff]  ;;  %v617_v47 = vld [vmem:[%s2209_s11 + $0x158] sm:$0xff]  ;;  %v616_v49 = vld [vmem:[%s2209_s11 + $0x150] sm:$0xff] }
  0xcb   : > { %992 = vmatpush2.msra.mxu1 %v700_v10  ;;  %736 = vmatprep.subr.mxu0 %v635_v11  ;;  %v682_v46 = vld [vmem:[%s2209_s11 + $0x360] sm:$0xff]  ;;  %v681_v48 = vld [vmem:[%s2209_s11 + $0x358] sm:$0xff]  ;;  %v680_v50 = vld [vmem:[%s2209_s11 + $0x350] sm:$0xff] }
  0xcc   : > { %993 = vmatprep.subr.mxu1 %v699_v12  ;;  %737 = vmatpush2.msra.mxu0 %v634_v13  ;;  %v615_v51 = vld [vmem:[%s2209_s11 + $0x148] sm:$0xff]  ;;  %v614_v53 = vld [vmem:[%s2209_s11 + $0x140] sm:$0xff]  ;;  %v613_v55 = vld [vmem:[%s2209_s11 + $0x138] sm:$0xff] }
  0xcd   : > { %994 = vmatpush2.msra.mxu1 %v698_v14  ;;  %738 = vmatprep.subr.mxu0 %v633_v15  ;;  %v679_v52 = vld [vmem:[%s2209_s11 + $0x348] sm:$0xff]  ;;  %v678_v54 = vld [vmem:[%s2209_s11 + $0x340] sm:$0xff]  ;;  %v677_v56 = vld [vmem:[%s2209_s11 + $0x338] sm:$0xff] }
  0xce   : > { %995 = vmatprep.subr.mxu1 %v697_v16  ;;  %739 = vmatpush2.msra.mxu0 %v632_v17  ;;  %v612_v57 = vld [vmem:[%s2209_s11 + $0x130] sm:$0xff]  ;;  %v611_v59 = vld [vmem:[%s2209_s11 + $0x128] sm:$0xff]  ;;  %v610_v61 = vld [vmem:[%s2209_s11 + $0x120] sm:$0xff] }
  0xcf   : > { %996 = vmatpush2.msra.mxu1 %v696_v18  ;;  %740 = vmatprep.subr.mxu0 %v631_v19  ;;  %v676_v58 = vld [vmem:[%s2209_s11 + $0x330] sm:$0xff]  ;;  %v675_v60 = vld [vmem:[%s2209_s11 + $0x328] sm:$0xff]  ;;  %v674_v62 = vld [vmem:[%s2209_s11 + $0x320] sm:$0xff] }
  0xd0   : > { %997 = vmatprep.subr.mxu1 %v695_v20  ;;  %741 = vmatpush2.msra.mxu0 %v630_v21  ;;  %v609_v63 = vld [vmem:[%s2209_s11 + $0x118] sm:$0xff]  ;;  %v608_v1 = vld [vmem:[%s2209_s11 + $0x110] sm:$0xff]  ;;  %v607_v3 = vld [vmem:[%s2209_s11 + $0x108] sm:$0xff] }
  0xd1   : > { %998 = vmatpush2.msra.mxu1 %v694_v22  ;;  %742 = vmatprep.subr.mxu0 %v629_v23  ;;  %v673_v0 = vld [vmem:[%s2209_s11 + $0x318] sm:$0xff]  ;;  %v672_v2 = vld [vmem:[%s2209_s11 + $0x310] sm:$0xff]  ;;  %v671_v4 = vld [vmem:[%s2209_s11 + $0x308] sm:$0xff] }
  0xd2   : > { %999 = vmatprep.subr.mxu1 %v693_v24  ;;  %743 = vmatpush2.msra.mxu0 %v628_v25  ;;  %v606_v5 = vld [vmem:[%s2209_s11 + $0x100] sm:$0xff]  ;;  %v447_v6 = vld [vmem:[%s2201_s3 + $0x8] sm:$0xff]  ;;  %v449_v8 = vld [vmem:[%s2201_s3 + $0x18] sm:$0xff] }
  0xd3   : > { %1000 = vmatpush2.msra.mxu1 %v692_v26  ;;  %744 = vmatprep.subr.mxu0 %v627_v27  ;;  %v670_v7 = vld [vmem:[%s2209_s11 + $0x300] sm:$0xff]  ;;  %v448_v10 = vld [vmem:[%s2201_s3 + $0x10] sm:$0xff]  ;;  %v451_v11 = vld [vmem:[%s2201_s3 + $0x28] sm:$0xff]  ;;  %s1762_s11 = sshll.u32 %s1920_s5, 4  ;;  %s1763_s11 = int_to_ptr.vmem [resolvable:$false] %s1762_s11 }
  0xd4   : > { %1001 = vmatprep.subr.mxu1 %v691_v28  ;;  %745 = vmatpush2.msra.mxu0 %v626_v29  ;;  %v446_v9 = vld [vmem:[%s2201_s3] sm:$0xff]  ;;  %v453_v12 = vld [vmem:[%s2201_s3 + $0x38] sm:$0xff]  ;;  %v452_v14 = vld [vmem:[%s2201_s3 + $0x30] sm:$0xff]  ;;  %s1764_s21 = scalar_lea.vmem %s1763_s11, 16384  ;;  %p1765_p1 = scmp.lt.s32.totalorder %s2714_s1, %s1763_s11 }
  0xd5   : > { %1002 = vmatpush2.msra.mxu1 %v690_v30  ;;  %746 = vmatprep.subr.mxu0 %v625_v31  ;;  %v450_v13 = vld [vmem:[%s2201_s3 + $0x20] sm:$0xff]  ;;  %v455_v15 = vld [vmem:[%s2201_s3 + $0x48] sm:$0xff]  ;;  %v457_v16 = vld [vmem:[%s2201_s3 + $0x58] sm:$0xff]  ;;  %p1766_p5 = scmp.lt.s32.totalorder %s1764_s21, %s1758_s6 }
  0xd6   : > { %1003 = vmatprep.subr.mxu1 %v689_v32  ;;  %747 = vmatpush2.msra.mxu0 %v624_v33  ;;  %v454_v17 = vld [vmem:[%s2201_s3 + $0x40] sm:$0xff]  ;;  %v456_v18 = vld [vmem:[%s2201_s3 + $0x50] sm:$0xff]  ;;  %v459_v19 = vld [vmem:[%s2201_s3 + $0x68] sm:$0xff] }
  0xd7   : > { %1004 = vmatpush2.msra.mxu1 %v688_v34  ;;  %748 = vmatprep.subr.mxu0 %v623_v35  ;;  %v461_v20 = vld [vmem:[%s2201_s3 + $0x78] sm:$0xff]  ;;  %v458_v21 = vld [vmem:[%s2201_s3 + $0x60] sm:$0xff]  ;;  %v460_v22 = vld [vmem:[%s2201_s3 + $0x70] sm:$0xff]  ;;  %p1767_p8 = por %p1766_p5, %p1765_p1 }
  0xd8   : > { %1005 = vmatprep.subr.mxu1 %v687_v36  ;;  %749 = vmatpush2.msra.mxu0 %v622_v37  ;;  %v463_v23 = vld [vmem:[%s2201_s3 + $0x88] sm:$0xff]  ;;  %v465_v24 = vld [vmem:[%s2201_s3 + $0x98] sm:$0xff]  ;;  %v462_v25 = vld [vmem:[%s2201_s3 + $0x80] sm:$0xff] }
  0xd9   : > { %1006 = vmatpush2.msra.mxu1 %v686_v38  ;;  %750 = vmatprep.subr.mxu0 %v621_v39  ;;  %v464_v26 = vld [vmem:[%s2201_s3 + $0x90] sm:$0xff]  ;;  %v467_v27 = vld [vmem:[%s2201_s3 + $0xa8] sm:$0xff]  ;;  %v469_v28 = vld [vmem:[%s2201_s3 + $0xb8] sm:$0xff]  ;;  %p1768_p12 = pnand %p1767_p8, %p1761_p2 }
  0xda   : > { %1007 = vmatprep.subr.mxu1 %v685_v40  ;;  %751 = vmatpush2.msra.mxu0 %v620_v41  ;;  %v466_v29 = vld [vmem:[%s2201_s3 + $0xa0] sm:$0xff]  ;;  %v468_v30 = vld [vmem:[%s2201_s3 + $0xb0] sm:$0xff]  ;;  %v471_v31 = vld [vmem:[%s2201_s3 + $0xc8] sm:$0xff] }
  0xdb   : > { %1008 = vmatpush2.msra.mxu1 %v684_v42  ;;  %752 = vmatprep.subr.mxu0 %v619_v43  ;;  %v473_v32 = vld [vmem:[%s2201_s3 + $0xd8] sm:$0xff]  ;;  %v470_v33 = vld [vmem:[%s2201_s3 + $0xc0] sm:$0xff]  ;;  %v472_v34 = vld [vmem:[%s2201_s3 + $0xd0] sm:$0xff] }
  0xdc   : > { %1009 = vmatprep.subr.mxu1 %v683_v44  ;;  %753 = vmatpush2.msra.mxu0 %v618_v45  ;;  %v475_v35 = vld [vmem:[%s2201_s3 + $0xe8] sm:$0xff]  ;;  %v477_v36 = vld [vmem:[%s2201_s3 + $0xf8] sm:$0xff]  ;;  %v474_v37 = vld [vmem:[%s2201_s3 + $0xe0] sm:$0xff] }
  0xdd   : > { %1010 = vmatpush2.msra.mxu1 %v682_v46  ;;  %754 = vmatprep.subr.mxu0 %v617_v47  ;;  %v476_v38 = vld [vmem:[%s2201_s3 + $0xf0] sm:$0xff]  ;;  %v479_v39 = vld [vmem:[%s2201_s3 + $0x108] sm:$0xff]  ;;  %v481_v40 = vld [vmem:[%s2201_s3 + $0x118] sm:$0xff] }
  0xde   : > { %1011 = vmatprep.subr.mxu1 %v681_v48  ;;  %755 = vmatpush2.msra.mxu0 %v616_v49  ;;  %v478_v41 = vld [vmem:[%s2201_s3 + $0x100] sm:$0xff]  ;;  %v480_v42 = vld [vmem:[%s2201_s3 + $0x110] sm:$0xff]  ;;  %v483_v43 = vld [vmem:[%s2201_s3 + $0x128] sm:$0xff] }
  0xdf   : > { %1012 = vmatpush2.msra.mxu1 %v680_v50  ;;  %756 = vmatprep.subr.mxu0 %v615_v51  ;;  %v485_v44 = vld [vmem:[%s2201_s3 + $0x138] sm:$0xff]  ;;  %v482_v45 = vld [vmem:[%s2201_s3 + $0x120] sm:$0xff]  ;;  %v484_v46 = vld [vmem:[%s2201_s3 + $0x130] sm:$0xff] }
  0xe0   : > { %1013 = vmatprep.subr.mxu1 %v679_v52  ;;  %757 = vmatpush2.msra.mxu0 %v614_v53  ;;  %v487_v47 = vld [vmem:[%s2201_s3 + $0x148] sm:$0xff]  ;;  %v489_v48 = vld [vmem:[%s2201_s3 + $0x158] sm:$0xff]  ;;  %v486_v49 = vld [vmem:[%s2201_s3 + $0x140] sm:$0xff] }
  0xe1   : > { %1014 = vmatpush2.msra.mxu1 %v678_v54  ;;  %758 = vmatprep.subr.mxu0 %v613_v55  ;;  %v488_v50 = vld [vmem:[%s2201_s3 + $0x150] sm:$0xff]  ;;  %v491_v51 = vld [vmem:[%s2201_s3 + $0x168] sm:$0xff]  ;;  %v493_v52 = vld [vmem:[%s2201_s3 + $0x178] sm:$0xff] }
  0xe2   : > { %1015 = vmatprep.subr.mxu1 %v677_v56  ;;  %759 = vmatpush2.msra.mxu0 %v612_v57  ;;  %v490_v53 = vld [vmem:[%s2201_s3 + $0x160] sm:$0xff]  ;;  %v492_v54 = vld [vmem:[%s2201_s3 + $0x170] sm:$0xff]  ;;  %v495_v55 = vld [vmem:[%s2201_s3 + $0x188] sm:$0xff] }
  0xe3   : > { %1016 = vmatpush2.msra.mxu1 %v676_v58  ;;  %760 = vmatprep.subr.mxu0 %v611_v59  ;;  %v497_v56 = vld [vmem:[%s2201_s3 + $0x198] sm:$0xff]  ;;  %v494_v57 = vld [vmem:[%s2201_s3 + $0x180] sm:$0xff]  ;;  %v496_v58 = vld [vmem:[%s2201_s3 + $0x190] sm:$0xff] }
  0xe4   : > { %1017 = vmatprep.subr.mxu1 %v675_v60  ;;  %761 = vmatpush2.msra.mxu0 %v610_v61  ;;  %v499_v59 = vld [vmem:[%s2201_s3 + $0x1a8] sm:$0xff]  ;;  %v501_v60 = vld [vmem:[%s2201_s3 + $0x1b8] sm:$0xff]  ;;  %v498_v61 = vld [vmem:[%s2201_s3 + $0x1a0] sm:$0xff] }
  0xe5   : > { %1018 = vmatpush2.msra.mxu1 %v674_v62  ;;  %762 = vmatprep.subr.mxu0 %v609_v63  ;;  %v500_v62 = vld [vmem:[%s2201_s3 + $0x1b0] sm:$0xff]  ;;  %v503_v63 = vld [vmem:[%s2201_s3 + $0x1c8] sm:$0xff] }
  0xe6   : > { %1019 = vmatprep.subr.mxu1 %v673_v0  ;;  %763 = vmatpush2.msra.mxu0 %v608_v1  ;;  %v505_v0 = vld [vmem:[%s2201_s3 + $0x1d8] sm:$0xff]  ;;  %v502_v1 = vld [vmem:[%s2201_s3 + $0x1c0] sm:$0xff] }
  0xe7   : > { %1020 = vmatpush2.msra.mxu1 %v672_v2  ;;  %764 = vmatprep.subr.mxu0 %v607_v3  ;;  %v504_v2 = vld [vmem:[%s2201_s3 + $0x1d0] sm:$0xff]  ;;  %v507_v3 = vld [vmem:[%s2201_s3 + $0x1e8] sm:$0xff] }
  0xe8   : > { %1021 = vmatprep.subr.mxu1 %v671_v4  ;;  %765 = vmatpush2.msra.mxu0 %v606_v5  ;;  %v509_v4 = vld [vmem:[%s2201_s3 + $0x1f8] sm:$0xff]  ;;  %v506_v5 = vld [vmem:[%s2201_s3 + $0x1e0] sm:$0xff] }
  0xe9   : > { %766 = vmatprep.mubr.f32.mxu0 %v447_v6  ;;  %1022 = vmatpush2.msra.mxu1 %v670_v7  ;;  %v508_v6 = vld [vmem:[%s2201_s3 + $0x1f0] sm:$0xff]  ;;  %v511_v7 = vld [vmem:[%s2201_s3 + $0x208] sm:$0xff] }
  0xea   : > { %1023 = vmatprep.mubr.f32.mxu1 %v449_v8  ;;  %767 = vmatmul.mubr.f32.vlgmr.msra.gmra.mxu0 %v446_v9  ;;  %v513_v8 = vld [vmem:[%s2201_s3 + $0x218] sm:$0xff]  ;;  %v510_v9 = vld [vmem:[%s2201_s3 + $0x200] sm:$0xff] }
  0xeb   : > { %1024 = vmatmul.mubr.f32.vlgmr.msra.gmra.mxu1 %v448_v10  ;;  %772 = vmatprep.mubr.f32.mxu0 %v451_v11  ;;  %v512_v10 = vld [vmem:[%s2201_s3 + $0x210] sm:$0xff]  ;;  %v515_v11 = vld [vmem:[%s2201_s3 + $0x228] sm:$0xff] }
  0xec   : > { %1029 = vmatprep.mubr.f32.mxu1 %v453_v12  ;;  %v517_v12 = vld [vmem:[%s2201_s3 + $0x238] sm:$0xff] }
  0xee   : > { %773 = vmatmul.mubr.f32.gmra.mxu0 %v450_v13  ;;  %v514_v13 = vld [vmem:[%s2201_s3 + $0x220] sm:$0xff] }
  0xef   : > { %1030 = vmatmul.mubr.f32.gmra.mxu1 %v452_v14  ;;  %778 = vmatprep.mubr.f32.mxu0 %v455_v15  ;;  %v516_v14 = vld [vmem:[%s2201_s3 + $0x230] sm:$0xff]  ;;  %v519_v15 = vld [vmem:[%s2201_s3 + $0x248] sm:$0xff] }
  0xf0   : > { %1035 = vmatprep.mubr.f32.mxu1 %v457_v16  ;;  %v521_v16 = vld [vmem:[%s2201_s3 + $0x258] sm:$0xff] }
  0xf2   : > { %779 = vmatmul.mubr.f32.gmra.mxu0 %v454_v17  ;;  %v518_v17 = vld [vmem:[%s2201_s3 + $0x240] sm:$0xff] }
  0xf3   : > { %1036 = vmatmul.mubr.f32.gmra.mxu1 %v456_v18  ;;  %784 = vmatprep.mubr.f32.mxu0 %v459_v19  ;;  %v520_v18 = vld [vmem:[%s2201_s3 + $0x250] sm:$0xff]  ;;  %v523_v19 = vld [vmem:[%s2201_s3 + $0x268] sm:$0xff] }
  0xf4   : > { %1041 = vmatprep.mubr.f32.mxu1 %v461_v20  ;;  %v525_v20 = vld [vmem:[%s2201_s3 + $0x278] sm:$0xff] }
  0xf6   : > { %785 = vmatmul.mubr.f32.gmra.mxu0 %v458_v21  ;;  %v522_v21 = vld [vmem:[%s2201_s3 + $0x260] sm:$0xff] }
  0xf7   : > { %1042 = vmatmul.mubr.f32.gmra.mxu1 %v460_v22  ;;  %790 = vmatprep.mubr.f32.mxu0 %v463_v23  ;;  %v524_v22 = vld [vmem:[%s2201_s3 + $0x270] sm:$0xff]  ;;  %v527_v23 = vld [vmem:[%s2201_s3 + $0x288] sm:$0xff] }
  0xf8   : > { %1047 = vmatprep.mubr.f32.mxu1 %v465_v24  ;;  %v529_v24 = vld [vmem:[%s2201_s3 + $0x298] sm:$0xff] }
  0xfa   : > { %791 = vmatmul.mubr.f32.gmra.mxu0 %v462_v25  ;;  %v526_v25 = vld [vmem:[%s2201_s3 + $0x280] sm:$0xff] }
  0xfb   : > { %1048 = vmatmul.mubr.f32.gmra.mxu1 %v464_v26  ;;  %796 = vmatprep.mubr.f32.mxu0 %v467_v27  ;;  %v528_v26 = vld [vmem:[%s2201_s3 + $0x290] sm:$0xff]  ;;  %v531_v27 = vld [vmem:[%s2201_s3 + $0x2a8] sm:$0xff] }
  0xfc   : > { %1053 = vmatprep.mubr.f32.mxu1 %v469_v28  ;;  %v533_v28 = vld [vmem:[%s2201_s3 + $0x2b8] sm:$0xff] }
  0xfe   : > { %797 = vmatmul.mubr.f32.gmra.mxu0 %v466_v29  ;;  %v530_v29 = vld [vmem:[%s2201_s3 + $0x2a0] sm:$0xff] }
  0xff   : > { %1054 = vmatmul.mubr.f32.gmra.mxu1 %v468_v30  ;;  %802 = vmatprep.mubr.f32.mxu0 %v471_v31  ;;  %v532_v30 = vld [vmem:[%s2201_s3 + $0x2b0] sm:$0xff]  ;;  %v535_v31 = vld [vmem:[%s2201_s3 + $0x2c8] sm:$0xff] }
 0x100   : > { %1059 = vmatprep.mubr.f32.mxu1 %v473_v32  ;;  %v537_v32 = vld [vmem:[%s2201_s3 + $0x2d8] sm:$0xff] }
 0x102   : > { %803 = vmatmul.mubr.f32.gmra.mxu0 %v470_v33  ;;  %v534_v33 = vld [vmem:[%s2201_s3 + $0x2c0] sm:$0xff] }
 0x103   : > { %1060 = vmatmul.mubr.f32.gmra.mxu1 %v472_v34  ;;  %808 = vmatprep.mubr.f32.mxu0 %v475_v35  ;;  %v536_v34 = vld [vmem:[%s2201_s3 + $0x2d0] sm:$0xff]  ;;  %v539_v35 = vld [vmem:[%s2201_s3 + $0x2e8] sm:$0xff] }
 0x104   : > { %1065 = vmatprep.mubr.f32.mxu1 %v477_v36  ;;  %v541_v36 = vld [vmem:[%s2201_s3 + $0x2f8] sm:$0xff] }
 0x106   : > { %809 = vmatmul.mubr.f32.gmra.mxu0 %v474_v37  ;;  %v538_v37 = vld [vmem:[%s2201_s3 + $0x2e0] sm:$0xff] }
 0x107   : > { %1066 = vmatmul.mubr.f32.gmra.mxu1 %v476_v38  ;;  %814 = vmatprep.mubr.f32.mxu0 %v479_v39  ;;  %v540_v38 = vld [vmem:[%s2201_s3 + $0x2f0] sm:$0xff]  ;;  %v543_v39 = vld [vmem:[%s2201_s3 + $0x308] sm:$0xff] }
 0x108   : > { %1071 = vmatprep.mubr.f32.mxu1 %v481_v40  ;;  %v545_v40 = vld [vmem:[%s2201_s3 + $0x318] sm:$0xff] }
 0x10a   : > { %815 = vmatmul.mubr.f32.gmra.mxu0 %v478_v41  ;;  %v542_v41 = vld [vmem:[%s2201_s3 + $0x300] sm:$0xff] }
 0x10b   : > { %1072 = vmatmul.mubr.f32.gmra.mxu1 %v480_v42  ;;  %820 = vmatprep.mubr.f32.mxu0 %v483_v43  ;;  %v544_v42 = vld [vmem:[%s2201_s3 + $0x310] sm:$0xff]  ;;  %v547_v43 = vld [vmem:[%s2201_s3 + $0x328] sm:$0xff] }
 0x10c   : > { %1077 = vmatprep.mubr.f32.mxu1 %v485_v44  ;;  %v549_v44 = vld [vmem:[%s2201_s3 + $0x338] sm:$0xff] }
 0x10e   : > { %821 = vmatmul.mubr.f32.gmra.mxu0 %v482_v45  ;;  %v546_v45 = vld [vmem:[%s2201_s3 + $0x320] sm:$0xff] }
 0x10f   : > { %1078 = vmatmul.mubr.f32.gmra.mxu1 %v484_v46  ;;  %826 = vmatprep.mubr.f32.mxu0 %v487_v47  ;;  %v548_v46 = vld [vmem:[%s2201_s3 + $0x330] sm:$0xff]  ;;  %v551_v47 = vld [vmem:[%s2201_s3 + $0x348] sm:$0xff] }
 0x110   : > { %1083 = vmatprep.mubr.f32.mxu1 %v489_v48  ;;  %v553_v48 = vld [vmem:[%s2201_s3 + $0x358] sm:$0xff] }
 0x112   : > { %827 = vmatmul.mubr.f32.gmra.mxu0 %v486_v49  ;;  %v550_v49 = vld [vmem:[%s2201_s3 + $0x340] sm:$0xff] }
 0x113   : > { %1084 = vmatmul.mubr.f32.gmra.mxu1 %v488_v50  ;;  %832 = vmatprep.mubr.f32.mxu0 %v491_v51  ;;  %v552_v50 = vld [vmem:[%s2201_s3 + $0x350] sm:$0xff]  ;;  %v555_v51 = vld [vmem:[%s2201_s3 + $0x368] sm:$0xff] }
 0x114   : > { %1089 = vmatprep.mubr.f32.mxu1 %v493_v52  ;;  %v557_v52 = vld [vmem:[%s2201_s3 + $0x378] sm:$0xff] }
 0x116   : > { %833 = vmatmul.mubr.f32.gmra.mxu0 %v490_v53  ;;  %v554_v53 = vld [vmem:[%s2201_s3 + $0x360] sm:$0xff] }
 0x117   : > { %1090 = vmatmul.mubr.f32.gmra.mxu1 %v492_v54  ;;  %838 = vmatprep.mubr.f32.mxu0 %v495_v55  ;;  %v556_v54 = vld [vmem:[%s2201_s3 + $0x370] sm:$0xff]  ;;  %v559_v55 = vld [vmem:[%s2201_s3 + $0x388] sm:$0xff] }
 0x118   : > { %1095 = vmatprep.mubr.f32.mxu1 %v497_v56  ;;  %v561_v56 = vld [vmem:[%s2201_s3 + $0x398] sm:$0xff] }
 0x11a   : > { %839 = vmatmul.mubr.f32.gmra.mxu0 %v494_v57  ;;  %v558_v57 = vld [vmem:[%s2201_s3 + $0x380] sm:$0xff] }
 0x11b   : > { %1096 = vmatmul.mubr.f32.gmra.mxu1 %v496_v58  ;;  %844 = vmatprep.mubr.f32.mxu0 %v499_v59  ;;  %v560_v58 = vld [vmem:[%s2201_s3 + $0x390] sm:$0xff]  ;;  %v563_v59 = vld [vmem:[%s2201_s3 + $0x3a8] sm:$0xff] }
 0x11c   : > { %1101 = vmatprep.mubr.f32.mxu1 %v501_v60  ;;  %v565_v60 = vld [vmem:[%s2201_s3 + $0x3b8] sm:$0xff] }
 0x11e   : > { %845 = vmatmul.mubr.f32.gmra.mxu0 %v498_v61  ;;  %v562_v61 = vld [vmem:[%s2201_s3 + $0x3a0] sm:$0xff] }
 0x11f   : > { %1102 = vmatmul.mubr.f32.gmra.mxu1 %v500_v62  ;;  %850 = vmatprep.mubr.f32.mxu0 %v503_v63  ;;  %v564_v62 = vld [vmem:[%s2201_s3 + $0x3b0] sm:$0xff]  ;;  %v567_v63 = vld [vmem:[%s2201_s3 + $0x3c8] sm:$0xff] }
 0x120   : > { %1107 = vmatprep.mubr.f32.mxu1 %v505_v0  ;;  %v569_v0 = vld [vmem:[%s2201_s3 + $0x3d8] sm:$0xff] }
 0x122   : > { %851 = vmatmul.mubr.f32.gmra.mxu0 %v502_v1  ;;  %v566_v1 = vld [vmem:[%s2201_s3 + $0x3c0] sm:$0xff] }
 0x123   : > { %1108 = vmatmul.mubr.f32.gmra.mxu1 %v504_v2  ;;  %856 = vmatprep.mubr.f32.mxu0 %v507_v3  ;;  %v568_v2 = vld [vmem:[%s2201_s3 + $0x3d0] sm:$0xff]  ;;  %v571_v3 = vld [vmem:[%s2201_s3 + $0x3e8] sm:$0xff] }
 0x124   : > { %1113 = vmatprep.mubr.f32.mxu1 %v509_v4  ;;  %v573_v4 = vld [vmem:[%s2201_s3 + $0x3f8] sm:$0xff] }
 0x126   : > { %857 = vmatmul.mubr.f32.gmra.mxu0 %v506_v5  ;;  %v570_v5 = vld [vmem:[%s2201_s3 + $0x3e0] sm:$0xff] }
 0x127   : > { %1114 = vmatmul.mubr.f32.gmra.mxu1 %v508_v6  ;;  %862 = vmatprep.mubr.f32.mxu0 %v511_v7  ;;  %v572_v6 = vld [vmem:[%s2201_s3 + $0x3f0] sm:$0xff]  ;;  %s2839_s3 = smov %s2838_s15 }
 0x128   : > { %1119 = vmatprep.mubr.f32.mxu1 %v513_v8  ;;  %v382_v8 = vld [vmem:[%s2224_s7] sm:$0xff] }
 0x12a   : > { %863 = vmatmul.mubr.f32.gmra.mxu0 %v510_v9 }
 0x12b   : > { %1120 = vmatmul.mubr.f32.gmra.mxu1 %v512_v10  ;;  %868 = vmatprep.mubr.f32.mxu0 %v515_v11 }
 0x12c   : > { %1125 = vmatprep.mubr.f32.mxu1 %v517_v12  ;;  %v383_v12 = vld [vmem:[%s2224_s7 + $0x8] sm:$0xff] }
 0x12e   : > { %869 = vmatmul.mubr.f32.gmra.mxu0 %v514_v13 }
 0x12f   : > { %1126 = vmatmul.mubr.f32.gmra.mxu1 %v516_v14  ;;  %874 = vmatprep.mubr.f32.mxu0 %v519_v15 }
 0x130   : > { %1131 = vmatprep.mubr.f32.mxu1 %v521_v16 }
 0x132   : > { %875 = vmatmul.mubr.f32.gmra.mxu0 %v518_v17  ;;  %v384_v17 = vld [vmem:[%s2224_s7 + $0x10] sm:$0xff] }
 0x133   : > { %1132 = vmatmul.mubr.f32.gmra.mxu1 %v520_v18  ;;  %880 = vmatprep.mubr.f32.mxu0 %v523_v19 }
 0x134   : > { %1137 = vmatprep.mubr.f32.mxu1 %v525_v20 }
 0x136   : > { %881 = vmatmul.mubr.f32.gmra.mxu0 %v522_v21 }
 0x137   : > { %1138 = vmatmul.mubr.f32.gmra.mxu1 %v524_v22  ;;  %886 = vmatprep.mubr.f32.mxu0 %v527_v23  ;;  %v385_v22 = vld [vmem:[%s2224_s7 + $0x18] sm:$0xff] }
 0x138   : > { %1143 = vmatprep.mubr.f32.mxu1 %v529_v24 }
 0x13a   : > { %887 = vmatmul.mubr.f32.gmra.mxu0 %v526_v25 }
 0x13b   : > { %1144 = vmatmul.mubr.f32.gmra.mxu1 %v528_v26  ;;  %892 = vmatprep.mubr.f32.mxu0 %v531_v27  ;;  %v386_v27 = vld [vmem:[%s2224_s7 + $0x20] sm:$0xff] }
 0x13c   : > { %1149 = vmatprep.mubr.f32.mxu1 %v533_v28 }
 0x13e   : > { %893 = vmatmul.mubr.f32.gmra.mxu0 %v530_v29 }
 0x13f   : > { %1150 = vmatmul.mubr.f32.gmra.mxu1 %v532_v30  ;;  %898 = vmatprep.mubr.f32.mxu0 %v535_v31 }
 0x140   : > { %1155 = vmatprep.mubr.f32.mxu1 %v537_v32  ;;  %v387_v32 = vld [vmem:[%s2224_s7 + $0x28] sm:$0xff] }
 0x142   : > { %899 = vmatmul.mubr.f32.gmra.mxu0 %v534_v33 }
 0x143   : > { %1156 = vmatmul.mubr.f32.gmra.mxu1 %v536_v34  ;;  %904 = vmatprep.mubr.f32.mxu0 %v539_v35 }
 0x144   : > { %1161 = vmatprep.mubr.f32.mxu1 %v541_v36 }
 0x146   : > { %905 = vmatmul.mubr.f32.gmra.mxu0 %v538_v37  ;;  %v388_v37 = vld [vmem:[%s2224_s7 + $0x30] sm:$0xff] }
 0x147   : > { %1162 = vmatmul.mubr.f32.gmra.mxu1 %v540_v38  ;;  %910 = vmatprep.mubr.f32.mxu0 %v543_v39 }
 0x148   : > { %1167 = vmatprep.mubr.f32.mxu1 %v545_v40 }
 0x14a   : > { %911 = vmatmul.mubr.f32.gmra.mxu0 %v542_v41 }
 0x14b   : > { %1168 = vmatmul.mubr.f32.gmra.mxu1 %v544_v42  ;;  %916 = vmatprep.mubr.f32.mxu0 %v547_v43  ;;  %v389_v42 = vld [vmem:[%s2224_s7 + $0x38] sm:$0xff] }
 0x14c   : > { %1173 = vmatprep.mubr.f32.mxu1 %v549_v44 }
 0x14e   : > { %917 = vmatmul.mubr.f32.gmra.mxu0 %v546_v45 }
 0x14f   : > { %1174 = vmatmul.mubr.f32.gmra.mxu1 %v548_v46  ;;  %922 = vmatprep.mubr.f32.mxu0 %v551_v47  ;;  %v390_v47 = vld [vmem:[%s2224_s7 + $0x40] sm:$0xff] }
 0x150   : > { %1179 = vmatprep.mubr.f32.mxu1 %v553_v48 }
 0x152   : > { %923 = vmatmul.mubr.f32.gmra.mxu0 %v550_v49 }
 0x153   : > { %1180 = vmatmul.mubr.f32.gmra.mxu1 %v552_v50  ;;  %928 = vmatprep.mubr.f32.mxu0 %v555_v51 }
 0x154   : > { %1185 = vmatprep.mubr.f32.mxu1 %v557_v52  ;;  %v391_v52 = vld [vmem:[%s2224_s7 + $0x48] sm:$0xff] }
 0x156   : > { %929 = vmatmul.mubr.f32.gmra.mxu0 %v554_v53 }
 0x157   : > { %1186 = vmatmul.mubr.f32.gmra.mxu1 %v556_v54  ;;  %934 = vmatprep.mubr.f32.mxu0 %v559_v55 }
 0x158   : > { %1191 = vmatprep.mubr.f32.mxu1 %v561_v56 }
 0x15a   : > { %935 = vmatmul.mubr.f32.gmra.mxu0 %v558_v57  ;;  %v392_v57 = vld [vmem:[%s2224_s7 + $0x50] sm:$0xff] }
 0x15b   : > { %1192 = vmatmul.mubr.f32.gmra.mxu1 %v560_v58  ;;  %940 = vmatprep.mubr.f32.mxu0 %v563_v59 }
 0x15c   : > { %1197 = vmatprep.mubr.f32.mxu1 %v565_v60 }
 0x15e   : > { %941 = vmatmul.mubr.f32.gmra.mxu0 %v562_v61 }
 0x15f   : > { %1198 = vmatmul.mubr.f32.gmra.mxu1 %v564_v62  ;;  %946 = vmatprep.mubr.f32.mxu0 %v567_v63  ;;  %v393_v62 = vld [vmem:[%s2224_s7 + $0x58] sm:$0xff] }
 0x160   : > { %1203 = vmatprep.mubr.f32.mxu1 %v569_v0 }
 0x162   : > { %947 = vmatmul.mubr.f32.gmra.mxu0 %v566_v1 }
 0x163   : > { %1204 = vmatmul.mubr.f32.gmra.mxu1 %v568_v2  ;;  %952 = vmatprep.mubr.f32.mxu0 %v571_v3  ;;  %v394_v3 = vld [vmem:[%s2224_s7 + $0x60] sm:$0xff] }
 0x164   : > { %1209 = vmatprep.mubr.f32.mxu1 %v573_v4 }
 0x166   : > { %953 = vmatmul.mubr.f32.gmra.mxu0 %v570_v5 }
 0x167   : > { %1210 = vmatmul.mubr.f32.gmra.mxu1 %v572_v6 }
 0x1aa   : > { %v768_v7 = vpop.f32.mrf.mxu0 }
 0x1ab   : > { %v1025_v9 = vpop.f32.mrf.mxu1 }
 0x1ac   : > { %v1026_v10 = vadd.f32 %v1025_v9, %v768_v7  ;;  %v770_v11 = vpop.f32.mrf.mxu0 }
 0x1ad   : > { %v1027_v13 = vpop.f32.mrf.mxu1 }
 0x1ae   : > { %v1216_v14 = vadd.f32 %v1026_v10, %v382_v8  ;;  %v1028_v15 = vadd.f32 %v1027_v13, %v770_v11  ;;  %v774_v16 = vpop.f32.mrf.mxu0  ;;  %v395_v8 = vld [vmem:[%s2224_s7 + $0x68] sm:$0xff]  ;;  %v396_v13 = vld [vmem:[%s2224_s7 + $0x70] sm:$0xff] }
 0x1af   : > { %v1031_v18 = vpop.f32.mrf.mxu1 }
 0x1b0   : > { %1280 = vst [vmem:[%s2224_s7] sm:$0xff] %v1216_v14  ;;  %v1217_v19 = vadd.f32 %v1028_v15, %v383_v12  ;;  %v1032_v20 = vadd.f32 %v1031_v18, %v774_v16  ;;  %v776_v21 = vpop.f32.mrf.mxu0  ;;  %v397_v18 = vld [vmem:[%s2224_s7 + $0x78] sm:$0xff] }
 0x1b1   : > { %v1033_v23 = vpop.f32.mrf.mxu1 }
 0x1b2   : > { %1281 = vst [vmem:[%s2224_s7 + $0x8] sm:$0xff] %v1217_v19  ;;  %v1218_v24 = vadd.f32 %v1032_v20, %v384_v17  ;;  %v1034_v25 = vadd.f32 %v1033_v23, %v776_v21  ;;  %v780_v26 = vpop.f32.mrf.mxu0  ;;  %v398_v23 = vld [vmem:[%s2224_s7 + $0x80] sm:$0xff] }
 0x1b3   : > { %v1037_v28 = vpop.f32.mrf.mxu1 }
 0x1b4   : > { %1282 = vst [vmem:[%s2224_s7 + $0x10] sm:$0xff] %v1218_v24  ;;  %v1219_v29 = vadd.f32 %v1034_v25, %v385_v22  ;;  %v1038_v30 = vadd.f32 %v1037_v28, %v780_v26  ;;  %v782_v31 = vpop.f32.mrf.mxu0  ;;  %v399_v28 = vld [vmem:[%s2224_s7 + $0x88] sm:$0xff] }
 0x1b5   : > { %v1039_v33 = vpop.f32.mrf.mxu1 }
 0x1b6   : > { %1283 = vst [vmem:[%s2224_s7 + $0x18] sm:$0xff] %v1219_v29  ;;  %v1220_v34 = vadd.f32 %v1038_v30, %v386_v27  ;;  %v1040_v35 = vadd.f32 %v1039_v33, %v782_v31  ;;  %v786_v36 = vpop.f32.mrf.mxu0  ;;  %v400_v33 = vld [vmem:[%s2224_s7 + $0x90] sm:$0xff] }
 0x1b7   : > { %v1043_v38 = vpop.f32.mrf.mxu1 }
 0x1b8   : > { %1284 = vst [vmem:[%s2224_s7 + $0x20] sm:$0xff] %v1220_v34  ;;  %v1221_v39 = vadd.f32 %v1040_v35, %v387_v32  ;;  %v1044_v40 = vadd.f32 %v1043_v38, %v786_v36  ;;  %v788_v41 = vpop.f32.mrf.mxu0  ;;  %v401_v38 = vld [vmem:[%s2224_s7 + $0x98] sm:$0xff] }
 0x1b9   : > { %v1045_v43 = vpop.f32.mrf.mxu1 }
 0x1ba   : > { %1285 = vst [vmem:[%s2224_s7 + $0x28] sm:$0xff] %v1221_v39  ;;  %v1222_v44 = vadd.f32 %v1044_v40, %v388_v37  ;;  %v1046_v45 = vadd.f32 %v1045_v43, %v788_v41  ;;  %v792_v46 = vpop.f32.mrf.mxu0  ;;  %v402_v43 = vld [vmem:[%s2224_s7 + $0xa0] sm:$0xff] }
 0x1bb   : > { %v1049_v48 = vpop.f32.mrf.mxu1 }
 0x1bc   : > { %1286 = vst [vmem:[%s2224_s7 + $0x30] sm:$0xff] %v1222_v44  ;;  %v1223_v49 = vadd.f32 %v1046_v45, %v389_v42  ;;  %v1050_v50 = vadd.f32 %v1049_v48, %v792_v46  ;;  %v794_v51 = vpop.f32.mrf.mxu0  ;;  %v403_v48 = vld [vmem:[%s2224_s7 + $0xa8] sm:$0xff] }
 0x1bd   : > { %v1051_v53 = vpop.f32.mrf.mxu1 }
 0x1be   : > { %1287 = vst [vmem:[%s2224_s7 + $0x38] sm:$0xff] %v1223_v49  ;;  %v1224_v54 = vadd.f32 %v1050_v50, %v390_v47  ;;  %v1052_v55 = vadd.f32 %v1051_v53, %v794_v51  ;;  %v798_v56 = vpop.f32.mrf.mxu0  ;;  %v404_v53 = vld [vmem:[%s2224_s7 + $0xb0] sm:$0xff] }
 0x1bf   : > { %v1055_v58 = vpop.f32.mrf.mxu1 }
 0x1c0   : > { %1288 = vst [vmem:[%s2224_s7 + $0x40] sm:$0xff] %v1224_v54  ;;  %v1225_v59 = vadd.f32 %v1052_v55, %v391_v52  ;;  %v1056_v60 = vadd.f32 %v1055_v58, %v798_v56  ;;  %v800_v61 = vpop.f32.mrf.mxu0  ;;  %v405_v58 = vld [vmem:[%s2224_s7 + $0xb8] sm:$0xff] }
 0x1c1   : > { %v1057_v63 = vpop.f32.mrf.mxu1 }
 0x1c2   : > { %1289 = vst [vmem:[%s2224_s7 + $0x48] sm:$0xff] %v1225_v59  ;;  %v1226_v0 = vadd.f32 %v1056_v60, %v392_v57  ;;  %v1058_v1 = vadd.f32 %v1057_v63, %v800_v61  ;;  %v804_v2 = vpop.f32.mrf.mxu0  ;;  %v406_v63 = vld [vmem:[%s2224_s7 + $0xc0] sm:$0xff] }
 0x1c3   : > { %v1061_v4 = vpop.f32.mrf.mxu1 }
 0x1c4   : > { %1290 = vst [vmem:[%s2224_s7 + $0x50] sm:$0xff] %v1226_v0  ;;  %v1227_v5 = vadd.f32 %v1058_v1, %v393_v62  ;;  %v1062_v6 = vadd.f32 %v1061_v4, %v804_v2  ;;  %v806_v7 = vpop.f32.mrf.mxu0  ;;  %v407_v4 = vld [vmem:[%s2224_s7 + $0xc8] sm:$0xff] }
 0x1c5   : > { %v1063_v9 = vpop.f32.mrf.mxu1 }
 0x1c6   : > { %1291 = vst [vmem:[%s2224_s7 + $0x58] sm:$0xff] %v1227_v5  ;;  %v1228_v10 = vadd.f32 %v1062_v6, %v394_v3  ;;  %v1064_v11 = vadd.f32 %v1063_v9, %v806_v7  ;;  %v810_v12 = vpop.f32.mrf.mxu0  ;;  %v408_v9 = vld [vmem:[%s2224_s7 + $0xd0] sm:$0xff] }
 0x1c7   : > { %v1067_v14 = vpop.f32.mrf.mxu1 }
 0x1c8   : > { %1292 = vst [vmem:[%s2224_s7 + $0x60] sm:$0xff] %v1228_v10  ;;  %v1229_v15 = vadd.f32 %v1064_v11, %v395_v8  ;;  %v1068_v16 = vadd.f32 %v1067_v14, %v810_v12  ;;  %v812_v17 = vpop.f32.mrf.mxu0  ;;  %v409_v14 = vld [vmem:[%s2224_s7 + $0xd8] sm:$0xff] }
 0x1c9   : > { %v1069_v19 = vpop.f32.mrf.mxu1 }
 0x1ca   : > { %1293 = vst [vmem:[%s2224_s7 + $0x68] sm:$0xff] %v1229_v15  ;;  %v1230_v20 = vadd.f32 %v1068_v16, %v396_v13  ;;  %v1070_v21 = vadd.f32 %v1069_v19, %v812_v17  ;;  %v816_v22 = vpop.f32.mrf.mxu0  ;;  %v410_v19 = vld [vmem:[%s2224_s7 + $0xe0] sm:$0xff] }
 0x1cb   : > { %v1073_v24 = vpop.f32.mrf.mxu1 }
 0x1cc   : > { %1294 = vst [vmem:[%s2224_s7 + $0x70] sm:$0xff] %v1230_v20  ;;  %v1231_v25 = vadd.f32 %v1070_v21, %v397_v18  ;;  %v1074_v26 = vadd.f32 %v1073_v24, %v816_v22  ;;  %v818_v27 = vpop.f32.mrf.mxu0  ;;  %v411_v24 = vld [vmem:[%s2224_s7 + $0xe8] sm:$0xff] }
 0x1cd   : > { %v1075_v29 = vpop.f32.mrf.mxu1 }
 0x1ce   : > { %1295 = vst [vmem:[%s2224_s7 + $0x78] sm:$0xff] %v1231_v25  ;;  %v1232_v30 = vadd.f32 %v1074_v26, %v398_v23  ;;  %v1076_v31 = vadd.f32 %v1075_v29, %v818_v27  ;;  %v822_v32 = vpop.f32.mrf.mxu0  ;;  %v412_v29 = vld [vmem:[%s2224_s7 + $0xf0] sm:$0xff] }
 0x1cf   : > { %v1079_v34 = vpop.f32.mrf.mxu1 }
 0x1d0   : > { %1296 = vst [vmem:[%s2224_s7 + $0x80] sm:$0xff] %v1232_v30  ;;  %v1233_v35 = vadd.f32 %v1076_v31, %v399_v28  ;;  %v1080_v36 = vadd.f32 %v1079_v34, %v822_v32  ;;  %v824_v37 = vpop.f32.mrf.mxu0  ;;  %v413_v34 = vld [vmem:[%s2224_s7 + $0xf8] sm:$0xff] }
 0x1d1   : > { %v1081_v39 = vpop.f32.mrf.mxu1 }
 0x1d2   : > { %1297 = vst [vmem:[%s2224_s7 + $0x88] sm:$0xff] %v1233_v35  ;;  %v1234_v40 = vadd.f32 %v1080_v36, %v400_v33  ;;  %v1082_v41 = vadd.f32 %v1081_v39, %v824_v37  ;;  %v828_v42 = vpop.f32.mrf.mxu0  ;;  %v414_v39 = vld [vmem:[%s2224_s7 + $0x100] sm:$0xff] }
 0x1d3   : > { %v1085_v44 = vpop.f32.mrf.mxu1 }
 0x1d4   : > { %1298 = vst [vmem:[%s2224_s7 + $0x90] sm:$0xff] %v1234_v40  ;;  %v1235_v45 = vadd.f32 %v1082_v41, %v401_v38  ;;  %v1086_v46 = vadd.f32 %v1085_v44, %v828_v42  ;;  %v830_v47 = vpop.f32.mrf.mxu0  ;;  %v415_v44 = vld [vmem:[%s2224_s7 + $0x108] sm:$0xff] }
 0x1d5   : > { %v1087_v49 = vpop.f32.mrf.mxu1 }
 0x1d6   : > { %1299 = vst [vmem:[%s2224_s7 + $0x98] sm:$0xff] %v1235_v45  ;;  %v1236_v50 = vadd.f32 %v1086_v46, %v402_v43  ;;  %v1088_v51 = vadd.f32 %v1087_v49, %v830_v47  ;;  %v834_v52 = vpop.f32.mrf.mxu0  ;;  %v416_v49 = vld [vmem:[%s2224_s7 + $0x110] sm:$0xff] }
 0x1d7   : > { %v1091_v54 = vpop.f32.mrf.mxu1 }
 0x1d8   : > { %1300 = vst [vmem:[%s2224_s7 + $0xa0] sm:$0xff] %v1236_v50  ;;  %v1237_v55 = vadd.f32 %v1088_v51, %v403_v48  ;;  %v1092_v56 = vadd.f32 %v1091_v54, %v834_v52  ;;  %v836_v57 = vpop.f32.mrf.mxu0  ;;  %v417_v54 = vld [vmem:[%s2224_s7 + $0x118] sm:$0xff] }
 0x1d9   : > { %v1093_v59 = vpop.f32.mrf.mxu1 }
 0x1da   : > { %1301 = vst [vmem:[%s2224_s7 + $0xa8] sm:$0xff] %v1237_v55  ;;  %v1238_v60 = vadd.f32 %v1092_v56, %v404_v53  ;;  %v1094_v61 = vadd.f32 %v1093_v59, %v836_v57  ;;  %v840_v62 = vpop.f32.mrf.mxu0  ;;  %v418_v59 = vld [vmem:[%s2224_s7 + $0x120] sm:$0xff] }
 0x1db   : > { %v1097_v0 = vpop.f32.mrf.mxu1 }
 0x1dc   : > { %1302 = vst [vmem:[%s2224_s7 + $0xb0] sm:$0xff] %v1238_v60  ;;  %v1239_v1 = vadd.f32 %v1094_v61, %v405_v58  ;;  %v1098_v2 = vadd.f32 %v1097_v0, %v840_v62  ;;  %v842_v3 = vpop.f32.mrf.mxu0  ;;  %v419_v0 = vld [vmem:[%s2224_s7 + $0x128] sm:$0xff] }
 0x1dd   : > { %v1099_v5 = vpop.f32.mrf.mxu1 }
 0x1de   : > { %1303 = vst [vmem:[%s2224_s7 + $0xb8] sm:$0xff] %v1239_v1  ;;  %v1240_v6 = vadd.f32 %v1098_v2, %v406_v63  ;;  %v1100_v7 = vadd.f32 %v1099_v5, %v842_v3  ;;  %v846_v8 = vpop.f32.mrf.mxu0  ;;  %v420_v5 = vld [vmem:[%s2224_s7 + $0x130] sm:$0xff] }
 0x1df   : > { %v1103_v10 = vpop.f32.mrf.mxu1 }
 0x1e0   : > { %1304 = vst [vmem:[%s2224_s7 + $0xc0] sm:$0xff] %v1240_v6  ;;  %v1241_v11 = vadd.f32 %v1100_v7, %v407_v4  ;;  %v1104_v12 = vadd.f32 %v1103_v10, %v846_v8  ;;  %v848_v13 = vpop.f32.mrf.mxu0  ;;  %v421_v10 = vld [vmem:[%s2224_s7 + $0x138] sm:$0xff] }
 0x1e1   : > { %v1105_v15 = vpop.f32.mrf.mxu1 }
 0x1e2   : > { %1305 = vst [vmem:[%s2224_s7 + $0xc8] sm:$0xff] %v1241_v11  ;;  %v1242_v16 = vadd.f32 %v1104_v12, %v408_v9  ;;  %v1106_v17 = vadd.f32 %v1105_v15, %v848_v13  ;;  %v852_v18 = vpop.f32.mrf.mxu0  ;;  %v422_v15 = vld [vmem:[%s2224_s7 + $0x140] sm:$0xff] }
 0x1e3   : > { %v1109_v20 = vpop.f32.mrf.mxu1 }
 0x1e4   : > { %1306 = vst [vmem:[%s2224_s7 + $0xd0] sm:$0xff] %v1242_v16  ;;  %v1243_v21 = vadd.f32 %v1106_v17, %v409_v14  ;;  %v1110_v22 = vadd.f32 %v1109_v20, %v852_v18  ;;  %v854_v23 = vpop.f32.mrf.mxu0  ;;  %v423_v20 = vld [vmem:[%s2224_s7 + $0x148] sm:$0xff] }
 0x1e5   : > { %v1111_v25 = vpop.f32.mrf.mxu1 }
 0x1e6   : > { %1307 = vst [vmem:[%s2224_s7 + $0xd8] sm:$0xff] %v1243_v21  ;;  %v1244_v26 = vadd.f32 %v1110_v22, %v410_v19  ;;  %v1112_v27 = vadd.f32 %v1111_v25, %v854_v23  ;;  %v858_v28 = vpop.f32.mrf.mxu0  ;;  %v424_v25 = vld [vmem:[%s2224_s7 + $0x150] sm:$0xff] }
 0x1e7   : > { %v1115_v30 = vpop.f32.mrf.mxu1 }
 0x1e8   : > { %1308 = vst [vmem:[%s2224_s7 + $0xe0] sm:$0xff] %v1244_v26  ;;  %v1245_v31 = vadd.f32 %v1112_v27, %v411_v24  ;;  %v1116_v32 = vadd.f32 %v1115_v30, %v858_v28  ;;  %v860_v33 = vpop.f32.mrf.mxu0  ;;  %v425_v30 = vld [vmem:[%s2224_s7 + $0x158] sm:$0xff] }
 0x1e9   : > { %v1117_v35 = vpop.f32.mrf.mxu1 }
 0x1ea   : > { %1309 = vst [vmem:[%s2224_s7 + $0xe8] sm:$0xff] %v1245_v31  ;;  %v1246_v36 = vadd.f32 %v1116_v32, %v412_v29  ;;  %v1118_v37 = vadd.f32 %v1117_v35, %v860_v33  ;;  %v864_v38 = vpop.f32.mrf.mxu0  ;;  %v426_v35 = vld [vmem:[%s2224_s7 + $0x160] sm:$0xff] }
 0x1eb   : > { %v1121_v40 = vpop.f32.mrf.mxu1 }
 0x1ec   : > { %1310 = vst [vmem:[%s2224_s7 + $0xf0] sm:$0xff] %v1246_v36  ;;  %v1247_v41 = vadd.f32 %v1118_v37, %v413_v34  ;;  %v1122_v42 = vadd.f32 %v1121_v40, %v864_v38  ;;  %v866_v43 = vpop.f32.mrf.mxu0  ;;  %v427_v40 = vld [vmem:[%s2224_s7 + $0x168] sm:$0xff] }
 0x1ed   : > { %v1123_v45 = vpop.f32.mrf.mxu1 }
 0x1ee   : > { %1311 = vst [vmem:[%s2224_s7 + $0xf8] sm:$0xff] %v1247_v41  ;;  %v1248_v46 = vadd.f32 %v1122_v42, %v414_v39  ;;  %v1124_v47 = vadd.f32 %v1123_v45, %v866_v43  ;;  %v870_v48 = vpop.f32.mrf.mxu0  ;;  %v428_v45 = vld [vmem:[%s2224_s7 + $0x170] sm:$0xff] }
 0x1ef   : > { %v1127_v50 = vpop.f32.mrf.mxu1 }
 0x1f0   : > { %1312 = vst [vmem:[%s2224_s7 + $0x100] sm:$0xff] %v1248_v46  ;;  %v1249_v51 = vadd.f32 %v1124_v47, %v415_v44  ;;  %v1128_v52 = vadd.f32 %v1127_v50, %v870_v48  ;;  %v872_v53 = vpop.f32.mrf.mxu0  ;;  %v429_v50 = vld [vmem:[%s2224_s7 + $0x178] sm:$0xff] }
 0x1f1   : > { %v1129_v55 = vpop.f32.mrf.mxu1 }
 0x1f2   : > { %1313 = vst [vmem:[%s2224_s7 + $0x108] sm:$0xff] %v1249_v51  ;;  %v1250_v56 = vadd.f32 %v1128_v52, %v416_v49  ;;  %v1130_v57 = vadd.f32 %v1129_v55, %v872_v53  ;;  %v876_v58 = vpop.f32.mrf.mxu0  ;;  %v430_v55 = vld [vmem:[%s2224_s7 + $0x180] sm:$0xff] }
 0x1f3   : > { %v1133_v60 = vpop.f32.mrf.mxu1 }
 0x1f4   : > { %1314 = vst [vmem:[%s2224_s7 + $0x110] sm:$0xff] %v1250_v56  ;;  %v1251_v61 = vadd.f32 %v1130_v57, %v417_v54  ;;  %v1134_v62 = vadd.f32 %v1133_v60, %v876_v58  ;;  %v878_v63 = vpop.f32.mrf.mxu0  ;;  %v431_v60 = vld [vmem:[%s2224_s7 + $0x188] sm:$0xff] }
 0x1f5   : > { %v1135_v1 = vpop.f32.mrf.mxu1 }
 0x1f6   : > { %1315 = vst [vmem:[%s2224_s7 + $0x118] sm:$0xff] %v1251_v61  ;;  %v1252_v2 = vadd.f32 %v1134_v62, %v418_v59  ;;  %v1136_v3 = vadd.f32 %v1135_v1, %v878_v63  ;;  %v882_v4 = vpop.f32.mrf.mxu0  ;;  %v432_v1 = vld [vmem:[%s2224_s7 + $0x190] sm:$0xff] }
 0x1f7   : > { %v1139_v6 = vpop.f32.mrf.mxu1 }
 0x1f8   : > { %1316 = vst [vmem:[%s2224_s7 + $0x120] sm:$0xff] %v1252_v2  ;;  %v1253_v7 = vadd.f32 %v1136_v3, %v419_v0  ;;  %v1140_v8 = vadd.f32 %v1139_v6, %v882_v4  ;;  %v884_v9 = vpop.f32.mrf.mxu0  ;;  %v433_v6 = vld [vmem:[%s2224_s7 + $0x198] sm:$0xff] }
 0x1f9   : > { %v1141_v11 = vpop.f32.mrf.mxu1 }
 0x1fa   : > { %1317 = vst [vmem:[%s2224_s7 + $0x128] sm:$0xff] %v1253_v7  ;;  %v1254_v12 = vadd.f32 %v1140_v8, %v420_v5  ;;  %v1142_v13 = vadd.f32 %v1141_v11, %v884_v9  ;;  %v888_v14 = vpop.f32.mrf.mxu0  ;;  %v434_v11 = vld [vmem:[%s2224_s7 + $0x1a0] sm:$0xff] }
 0x1fb   : > { %v1145_v16 = vpop.f32.mrf.mxu1 }
 0x1fc   : > { %1318 = vst [vmem:[%s2224_s7 + $0x130] sm:$0xff] %v1254_v12  ;;  %v1255_v17 = vadd.f32 %v1142_v13, %v421_v10  ;;  %v1146_v18 = vadd.f32 %v1145_v16, %v888_v14  ;;  %v890_v19 = vpop.f32.mrf.mxu0  ;;  %v435_v16 = vld [vmem:[%s2224_s7 + $0x1a8] sm:$0xff] }
 0x1fd   : > { %v1147_v21 = vpop.f32.mrf.mxu1 }
 0x1fe   : > { %1319 = vst [vmem:[%s2224_s7 + $0x138] sm:$0xff] %v1255_v17  ;;  %v1256_v22 = vadd.f32 %v1146_v18, %v422_v15  ;;  %v1148_v23 = vadd.f32 %v1147_v21, %v890_v19  ;;  %v894_v24 = vpop.f32.mrf.mxu0  ;;  %v436_v21 = vld [vmem:[%s2224_s7 + $0x1b0] sm:$0xff] }
 0x1ff   : > { %v1151_v26 = vpop.f32.mrf.mxu1 }
 0x200   : > { %1320 = vst [vmem:[%s2224_s7 + $0x140] sm:$0xff] %v1256_v22  ;;  %v1257_v27 = vadd.f32 %v1148_v23, %v423_v20  ;;  %v1152_v28 = vadd.f32 %v1151_v26, %v894_v24  ;;  %v896_v29 = vpop.f32.mrf.mxu0  ;;  %v437_v26 = vld [vmem:[%s2224_s7 + $0x1b8] sm:$0xff] }
 0x201   : > { %v1153_v31 = vpop.f32.mrf.mxu1 }
 0x202   : > { %1321 = vst [vmem:[%s2224_s7 + $0x148] sm:$0xff] %v1257_v27  ;;  %v1258_v32 = vadd.f32 %v1152_v28, %v424_v25  ;;  %v1154_v33 = vadd.f32 %v1153_v31, %v896_v29  ;;  %v900_v34 = vpop.f32.mrf.mxu0  ;;  %v438_v31 = vld [vmem:[%s2224_s7 + $0x1c0] sm:$0xff] }
 0x203   : > { %v1157_v36 = vpop.f32.mrf.mxu1 }
 0x204   : > { %1322 = vst [vmem:[%s2224_s7 + $0x150] sm:$0xff] %v1258_v32  ;;  %v1259_v37 = vadd.f32 %v1154_v33, %v425_v30  ;;  %v1158_v38 = vadd.f32 %v1157_v36, %v900_v34  ;;  %v902_v39 = vpop.f32.mrf.mxu0  ;;  %v439_v36 = vld [vmem:[%s2224_s7 + $0x1c8] sm:$0xff] }
 0x205   : > { %v1159_v41 = vpop.f32.mrf.mxu1 }
 0x206   : > { %1323 = vst [vmem:[%s2224_s7 + $0x158] sm:$0xff] %v1259_v37  ;;  %v1260_v42 = vadd.f32 %v1158_v38, %v426_v35  ;;  %v1160_v43 = vadd.f32 %v1159_v41, %v902_v39  ;;  %v906_v44 = vpop.f32.mrf.mxu0  ;;  %v440_v41 = vld [vmem:[%s2224_s7 + $0x1d0] sm:$0xff] }
 0x207   : > { %v1163_v46 = vpop.f32.mrf.mxu1 }
 0x208   : > { %1324 = vst [vmem:[%s2224_s7 + $0x160] sm:$0xff] %v1260_v42  ;;  %v1261_v47 = vadd.f32 %v1160_v43, %v427_v40  ;;  %v1164_v48 = vadd.f32 %v1163_v46, %v906_v44  ;;  %v908_v49 = vpop.f32.mrf.mxu0  ;;  %v441_v46 = vld [vmem:[%s2224_s7 + $0x1d8] sm:$0xff] }
 0x209   : > { %v1165_v51 = vpop.f32.mrf.mxu1 }
 0x20a   : > { %1325 = vst [vmem:[%s2224_s7 + $0x168] sm:$0xff] %v1261_v47  ;;  %v1262_v52 = vadd.f32 %v1164_v48, %v428_v45  ;;  %v1166_v53 = vadd.f32 %v1165_v51, %v908_v49  ;;  %v912_v54 = vpop.f32.mrf.mxu0  ;;  %v442_v51 = vld [vmem:[%s2224_s7 + $0x1e0] sm:$0xff] }
 0x20b   : > { %v1169_v56 = vpop.f32.mrf.mxu1 }
 0x20c   : > { %1326 = vst [vmem:[%s2224_s7 + $0x170] sm:$0xff] %v1262_v52  ;;  %v1263_v57 = vadd.f32 %v1166_v53, %v429_v50  ;;  %v1170_v58 = vadd.f32 %v1169_v56, %v912_v54  ;;  %v914_v59 = vpop.f32.mrf.mxu0  ;;  %v443_v56 = vld [vmem:[%s2224_s7 + $0x1e8] sm:$0xff] }
 0x20d   : > { %v1171_v61 = vpop.f32.mrf.mxu1 }
 0x20e   : > { %1327 = vst [vmem:[%s2224_s7 + $0x178] sm:$0xff] %v1263_v57  ;;  %v1264_v62 = vadd.f32 %v1170_v58, %v430_v55  ;;  %v1172_v63 = vadd.f32 %v1171_v61, %v914_v59  ;;  %v918_v0 = vpop.f32.mrf.mxu0  ;;  %v444_v61 = vld [vmem:[%s2224_s7 + $0x1f0] sm:$0xff] }
 0x20f   : > { %v1175_v2 = vpop.f32.mrf.mxu1 }
 0x210   : > { %1328 = vst [vmem:[%s2224_s7 + $0x180] sm:$0xff] %v1264_v62  ;;  %v1265_v3 = vadd.f32 %v1172_v63, %v431_v60  ;;  %v1176_v4 = vadd.f32 %v1175_v2, %v918_v0  ;;  %v920_v5 = vpop.f32.mrf.mxu0  ;;  %v445_v2 = vld [vmem:[%s2224_s7 + $0x1f8] sm:$0xff] }
 0x211   : > { %v1177_v7 = vpop.f32.mrf.mxu1 }
 0x212   : > { %1329 = vst [vmem:[%s2224_s7 + $0x188] sm:$0xff] %v1265_v3  ;;  %v1266_v8 = vadd.f32 %v1176_v4, %v432_v1  ;;  %v1178_v9 = vadd.f32 %v1177_v7, %v920_v5  ;;  %v924_v10 = vpop.f32.mrf.mxu0 }
 0x213   : > { %v1181_v12 = vpop.f32.mrf.mxu1 }
 0x214   : > { %1330 = vst [vmem:[%s2224_s7 + $0x190] sm:$0xff] %v1266_v8  ;;  %v1267_v13 = vadd.f32 %v1178_v9, %v433_v6  ;;  %v1182_v14 = vadd.f32 %v1181_v12, %v924_v10  ;;  %v926_v15 = vpop.f32.mrf.mxu0 }
 0x215   : > { %v1183_v17 = vpop.f32.mrf.mxu1 }
 0x216   : > { %1331 = vst [vmem:[%s2224_s7 + $0x198] sm:$0xff] %v1267_v13  ;;  %v1268_v18 = vadd.f32 %v1182_v14, %v434_v11  ;;  %v1184_v19 = vadd.f32 %v1183_v17, %v926_v15  ;;  %v930_v20 = vpop.f32.mrf.mxu0 }
 0x217   : > { %v1187_v22 = vpop.f32.mrf.mxu1 }
 0x218   : > { %1332 = vst [vmem:[%s2224_s7 + $0x1a0] sm:$0xff] %v1268_v18  ;;  %v1269_v23 = vadd.f32 %v1184_v19, %v435_v16  ;;  %v1188_v24 = vadd.f32 %v1187_v22, %v930_v20  ;;  %v932_v25 = vpop.f32.mrf.mxu0 }
 0x219   : > { %v1189_v27 = vpop.f32.mrf.mxu1 }
 0x21a   : > { %1333 = vst [vmem:[%s2224_s7 + $0x1a8] sm:$0xff] %v1269_v23  ;;  %v1270_v28 = vadd.f32 %v1188_v24, %v436_v21  ;;  %v1190_v29 = vadd.f32 %v1189_v27, %v932_v25  ;;  %v936_v30 = vpop.f32.mrf.mxu0 }
 0x21b   : > { %v1193_v32 = vpop.f32.mrf.mxu1 }
 0x21c   : > { %1334 = vst [vmem:[%s2224_s7 + $0x1b0] sm:$0xff] %v1270_v28  ;;  %v1271_v33 = vadd.f32 %v1190_v29, %v437_v26  ;;  %v1194_v34 = vadd.f32 %v1193_v32, %v936_v30  ;;  %v938_v35 = vpop.f32.mrf.mxu0 }
 0x21d   : > { %v1195_v37 = vpop.f32.mrf.mxu1 }
 0x21e   : > { %1335 = vst [vmem:[%s2224_s7 + $0x1b8] sm:$0xff] %v1271_v33  ;;  %v1272_v38 = vadd.f32 %v1194_v34, %v438_v31  ;;  %v1196_v39 = vadd.f32 %v1195_v37, %v938_v35  ;;  %v942_v40 = vpop.f32.mrf.mxu0 }
 0x21f   : > { %v1199_v42 = vpop.f32.mrf.mxu1 }
 0x220   : > { %1336 = vst [vmem:[%s2224_s7 + $0x1c0] sm:$0xff] %v1272_v38  ;;  %v1273_v43 = vadd.f32 %v1196_v39, %v439_v36  ;;  %v1200_v44 = vadd.f32 %v1199_v42, %v942_v40  ;;  %v944_v45 = vpop.f32.mrf.mxu0 }
 0x221   : > { %v1201_v47 = vpop.f32.mrf.mxu1 }
 0x222   : > { %1337 = vst [vmem:[%s2224_s7 + $0x1c8] sm:$0xff] %v1273_v43  ;;  %v1274_v48 = vadd.f32 %v1200_v44, %v440_v41  ;;  %v1202_v49 = vadd.f32 %v1201_v47, %v944_v45  ;;  %v948_v50 = vpop.f32.mrf.mxu0 }
 0x223   : > { %v1205_v52 = vpop.f32.mrf.mxu1 }
 0x224   : > { %1338 = vst [vmem:[%s2224_s7 + $0x1d0] sm:$0xff] %v1274_v48  ;;  %v1275_v53 = vadd.f32 %v1202_v49, %v441_v46  ;;  %v1206_v54 = vadd.f32 %v1205_v52, %v948_v50  ;;  %v950_v55 = vpop.f32.mrf.mxu0 }
 0x225   : > { %v1207_v57 = vpop.f32.mrf.mxu1 }
 0x226   : > { %1339 = vst [vmem:[%s2224_s7 + $0x1d8] sm:$0xff] %v1275_v53  ;;  %v1276_v58 = vadd.f32 %v1206_v54, %v442_v51  ;;  %v1208_v59 = vadd.f32 %v1207_v57, %v950_v55  ;;  %v954_v60 = vpop.f32.mrf.mxu0 }
 0x227   : > { %v1211_v62 = vpop.f32.mrf.mxu1 }
 0x228   : > { %1340 = vst [vmem:[%s2224_s7 + $0x1e0] sm:$0xff] %v1276_v58  ;;  %v1277_v63 = vadd.f32 %v1208_v59, %v443_v56  ;;  %v1212_v0 = vadd.f32 %v1211_v62, %v954_v60  ;;  %v956_v1 = vpop.f32.mrf.mxu0 }
 0x229   : > { %v1213_v3 = vpop.f32.mrf.mxu1 }
 0x22a   : > { %1341 = vst [vmem:[%s2224_s7 + $0x1e8] sm:$0xff] %v1277_v63  ;;  %v1278_v4 = vadd.f32 %v1212_v0, %v444_v61  ;;  %v1214_v5 = vadd.f32 %v1213_v3, %v956_v1 }
 0x22c   : > { %1342 = vst [vmem:[%s2224_s7 + $0x1f0] sm:$0xff] %v1278_v4  ;;  %v1279_v6 = vadd.f32 %v1214_v5, %v445_v2 }
 0x22e   : > { %1343 = vst [vmem:[%s2224_s7 + $0x1f8] sm:$0xff] %v1279_v6 }
 0x22f   : > { %1771 = shalt.err (!%p1768_p12)
}
 0x230   : > { %s1772_s10 = scalar_lea.hbm %s2712_s24, 8192  ;;  %s1776_s4 = scalar_lea.hbm %s2839_s3, 16384 }
 0x231   : > { %p1773_p4 = scmp.ne.s32.totalorder %s2712_s24, %s1772_s10  ;;  %p1777_p7 = scmp.lt.s32.totalorder %s2712_s24, %s2839_s3 }
 0x232   : > { %p1778_p6 = scmp.lt.s32.totalorder %s1776_s4, %s1772_s10 }
 0x233   : > { %p1774_p10 = pnand %p1773_p4, %p2840_p0 }
 0x234   : > { %p1779_p9 = por %p1778_p6, %p1777_p7 }
 0x235   : > { %p1775_p11 = pneg %p1774_p10 }
 0x237   : > { %p1780_p13 = pnand %p1779_p9, %p1775_p11 }
 0x239   : > { %1783 = shalt.err (!%p1780_p13)
}
 0x23a   : > { %s1921_s18 = smov 256   ;;  %s1922_s29 = smov 512  }
 0x23b   : > { %s1923_s15 = smov 16  }
 0x23c   : > { %1536 = dma.vmem_to_hbm [thread:$0]  (%p2840_p0), %s2714_s1, 8192, %s2712_s24, %s1345_s0, %s1921_s18, %s1922_s29, %s1923_s15  }
 0x23d PF: > { %p1553_p3 = scmp.ge.s32.totalorder %s1910_s25, 2  ;;  %s1376_s6 = sand.u32 1, %s1858_s12  }
 0x23e   : > { %p2841_p2 = scmp.ne.s32.totalorder %s2832_s23, 0  ;;  %s1377_s5 = scalar_lea.sflag [#allocation4], %s1376_s6 }
 0x240   : > { %p1549_p1 = pnand %p1553_p3, %p2841_p2 }
 0x242   : > { %p1550_p5 = pneg %p1549_p1 }
 0x244   : > { %1853 = dma.done.wait (%p1550_p5), %s1377_s5, 8192  }
 0x245   : > { %1855 = vsyncadd (%p1550_p5), %s1377_s5, 4294959104  ;;  %s22_s25 = sadd.s32 1, %s1910_s25   ;;  %s2843_s9 = sld [smem:[#allocation18_spill]] }
 0x246   : > { %p2746_p8 = scmp.ge.s32.totalorder %s22_s25, 6   ;;  %s2844_s21 = sld [smem:[#allocation15_spill]] }
 0x247   : > { %s2845_s22 = sld [smem:[#allocation16_spill]]  ;;  %s2848_s12 = smov %s1862_s13 }
 0x248   : > { %s2846_s23 = sld [smem:[#allocation17_spill]]  ;;  %s2849_s13 = smov %s1866_s14 }
 0x249   : > { %s2847_s24 = sld [smem:[#allocation19_spill]]  ;;  %s2850_s14 = smov %s2159_s30 }
 0x24a   : > { %s2851_s15 = smov %s1874_s16  ;;  %s2852_s16 = smov %s1878_s17 }
 0x24b   : > { %s2853_s17 = smov %s2164_s8  ;;  %s2854_s18 = smov %s1886_s19 }
 0x24c   : > { %s2855_s19 = smov %s1890_s20  ;;  %s2856_s20 = smov %s2843_s9 }
 0x24d   :  { %21 = sbr.rel (!%p2746_p8) target bundleno = 16 (0x10), region = 105 }
 0x252   :  { %1382 = vsyncpa [#allocation3], 1 }
 0x253   :  { %1384 = vsyncpa [#allocation3 + $0x1], 1 }
 0x254   :  { %1385 = vsyncpa [#allocation6], 1 }
 0x255   :  { %1387 = vsyncpa [#allocation6 + $0x1], 1 }
 0x256   :  { %1388 = vsyncpa [#allocation4], 1 }
 0x257   :  { %1390 = vsyncpa [#allocation4 + $0x1], 1 }

</bundles_post_ra>
